<compile_context>
chip_gen: v7x
topology: tpu7x:2x2x1
jax: 0.10.0
libtpu: 0.0.40
codegen_flags: <defaults>
</compile_context>

<pallas_src>
import functools
import math

import jax
import jax.numpy as jnp
from jax.experimental import pallas as pl
from jax.experimental.pallas import tpu as pltpu


LN_EPS = 1e-12
_INV_SQRT2 = 1.0 / math.sqrt(2.0)


# ----------------------------- in-kernel helpers ----------------------------

def _layernorm(x, g, b, eps=LN_EPS):
    mean = jnp.mean(x, axis=-1, keepdims=True)
    var = jnp.mean(jnp.square(x - mean), axis=-1, keepdims=True)
    return (x - mean) * jax.lax.rsqrt(var + eps) * g + b


def _mm(a_f32, w_bf16):
    # bf16 MXU operands, fp32 accumulation (weights are already bf16 in HBM).
    return jnp.dot(a_f32.astype(jnp.bfloat16), w_bf16,
                   preferred_element_type=jnp.float32)


# ------------------------------ fused stack kernel ---------------------------

def bert_stack_kernel(x_ref, embg_ref, embb_ref,
                      wqkv_ref, bqkv_ref, wo_ref, bo_ref,
                      ln1g_ref, ln1b_ref, w1_ref, b1_ref, w2_ref, b2_ref,
                      ln2g_ref, ln2b_ref, o_ref, *, num_heads, batch, seq):
    l = pl.program_id(0)

    # Layer 0: fuse the embedding LayerNorm and seed the resident carry block.
    # o_ref has a constant block index across the layer axis, so it stays in
    # VMEM for the whole grid and carries the hidden state between layers.
    @pl.when(l == 0)
    def _():
        o_ref[...] = _layernorm(x_ref[...], embg_ref[...], embb_ref[...])

    x = o_ref[...]                                    # (B*S, H) fp32
    n_tok, H = x.shape
    dh = H // num_heads

    # ---- fused QKV projection: one lane-dense 3H-wide MXU pass ----
    qkv = _mm(x, wqkv_ref[...]) + bqkv_ref[...]       # (B*S, 3H) fp32
    q = qkv[:, :H]                                    # 1/sqrt(dh) pre-folded into wqkv
    k = qkv[:, H:2 * H]
    v = qkv[:, 2 * H:]

    # ---- attention: bf16 batched-over-B QK^T / P@V per head, heads merged by
    #      a single lane concat, then ONE (N,H)@(H,H) output projection ----
    # TODO(synk): attention_mask / nonzero token_type_ids (BertModel kwargs)
    # are not supported; this attends over all S positions unconditionally.
    ctx_heads = []
    for h in range(num_heads):
        sl = slice(h * dh, (h + 1) * dh)
        qh = q[:, sl].reshape(batch, seq, dh).astype(jnp.bfloat16)
        kh = k[:, sl].reshape(batch, seq, dh).astype(jnp.bfloat16)
        vh = v[:, sl].reshape(batch, seq, dh).astype(jnp.bfloat16)
        s = jnp.einsum('bqd,bkd->bqk', qh, kh,
                       preferred_element_type=jnp.float32)       # (B, S, S) fp32
        s = s - jnp.max(s, axis=-1, keepdims=True)
        p = jnp.exp(s)
        # approx reciprocal -> EUP slot; tiny deliberate deviation from torch's
        # exact divide (documented).
        p = p * pl.reciprocal(jnp.sum(p, axis=-1, keepdims=True), approx=True)
        ctx_h = jnp.einsum('bqk,bkd->bqd', p.astype(jnp.bfloat16), vh,
                           preferred_element_type=jnp.float32)   # (B, S, dh)
        ctx_heads.append(ctx_h.reshape(n_tok, dh))
    ctx = jnp.concatenate(ctx_heads, axis=-1)         # (B*S, H) fp32
    attn = _mm(ctx, wo_ref[...]) + bo_ref[...]

    # ---- add & LayerNorm 1 (fp32 elementwise) ----
    x1 = _layernorm(x + attn, ln1g_ref[...], ln1b_ref[...])

    # ---- feed-forward: dense + exact (erf) GELU + dense ----
    hid = _mm(x1, w1_ref[...]) + b1_ref[...]
    hid = 0.5 * hid * (1.0 + jax.lax.erf(hid * _INV_SQRT2))
    ffn = _mm(hid, w2_ref[...]) + b2_ref[...]

    # ---- add & LayerNorm 2; write back into the resident carry block ----
    o_ref[...] = _layernorm(x1 + ffn, ln2g_ref[...], ln2b_ref[...])


# ------------------------------ JAX wrapper ----------------------------------

def bert_encoder_stack(emb, emb_g, emb_b, stacked, *, num_heads, batch, seq):
    n_tok, H = emb.shape
    L = stacked["wqkv"].shape[0]
    I = stacked["w1"].shape[-1]

    weight_names = ("wqkv", "bqkv", "wo", "bo", "ln1_g", "ln1_b",
                    "w1", "b1", "w2", "b2", "ln2_g", "ln2_b")
    weights = [stacked[n] for n in weight_names]

    tok_spec = pl.BlockSpec((n_tok, H), lambda l: (0, 0))

    def full_spec(arr):
        return pl.BlockSpec(arr.shape, lambda l, nd=arr.ndim: (0,) * nd)

    def layer_spec(arr):
        # leading [L] dim squeezed; index_map streams layer l's slab.
        return pl.BlockSpec((None,) + tuple(arr.shape[1:]),
                            lambda l, nd=arr.ndim: (l,) + (0,) * (nd - 1))

    kern = functools.partial(bert_stack_kernel, num_heads=num_heads,
                             batch=batch, seq=seq)

    # advisory cost estimate (per layer, summed over the layer grid axis)
    matmul_flops = L * (2 * n_tok * H * 3 * H           # fused QKV
                        + 4 * batch * seq * seq * H     # QK^T + P@V over heads
                        + 2 * n_tok * H * H             # output projection
                        + 4 * n_tok * H * I)            # FFN (two matmuls)
    transcendentals = L * (batch * num_heads * seq * seq + n_tok * I + 4 * n_tok)
    bytes_accessed = (2 * n_tok * H * 4 + 2 * H * 4
                      + sum(int(w.size) * int(w.dtype.itemsize) for w in weights))

    return pl.pallas_call(
        kern,
        out_shape=jax.ShapeDtypeStruct((n_tok, H), jnp.float32),
        grid=(L,),
        in_specs=[tok_spec, full_spec(emb_g), full_spec(emb_b)]
                 + [layer_spec(w) for w in weights],
        out_specs=tok_spec,
        compiler_params=pltpu.CompilerParams(
            dimension_semantics=("arbitrary",),          # sequential carry over layers
            # TODO(synk): at BERT-base size on v7x (64 MiB VMEM), also tile the
            # FFN intermediate dim so w1/w2 stream instead of staying resident.
            vmem_limit_bytes=32 * 1024 * 1024),
        cost_estimate=pl.CostEstimate(
            flops=matmul_flops,
            transcendentals=transcendentals,
            bytes_accessed=bytes_accessed),
    )(emb, emb_g, emb_b, *weights)


# --------------------------- model definition --------------------------------

class BertConfig:
    vocab_size = 50
    hidden = 32
    num_heads = 4
    num_layers = 2
    intermediate = 64
    max_position = 32
    type_vocab = 2


def init_params(key, cfg):
    std = 0.02
    H, I, L = cfg.hidden, cfg.intermediate, cfg.num_layers
    dh = H // cfg.num_heads
    keys = iter(jax.random.split(key, 64))

    def nrm(shape):
        return jax.random.normal(next(keys), shape, jnp.float32) * std

    def zeros(shape):
        return jnp.zeros(shape, jnp.float32)

    def ones(shape):
        return jnp.ones(shape, jnp.float32)

    # Fold 1/sqrt(dh) into the Q columns of the fused QKV weight (one-time
    # host-side transform; removes a per-step (N,H) VPU multiply in-kernel).
    scale = 1.0 / math.sqrt(dh)
    wqkv = nrm((L, H, 3 * H))
    wqkv = wqkv.at[:, :, :H].multiply(scale)
    bqkv = zeros((L, 1, 3 * H))   # Q slice would also be scaled if nonzero

    return {
        "word_emb": nrm((cfg.vocab_size, H)),
        "pos_emb": nrm((cfg.max_position, H)),
        "type_emb": nrm((cfg.type_vocab, H)),
        "emb_ln_g": ones((1, H)),
        "emb_ln_b": zeros((1, H)),
        "stack": {
            # MXU weights stored bf16 (half DMA/VMEM); biases & LN params fp32.
            "wqkv": wqkv.astype(jnp.bfloat16),
            "bqkv": bqkv,
            "wo": nrm((L, H, H)).astype(jnp.bfloat16),
            "bo": zeros((L, 1, H)),
            "ln1_g": ones((L, 1, H)),
            "ln1_b": zeros((L, 1, H)),
            "w1": nrm((L, H, I)).astype(jnp.bfloat16),
            "b1": zeros((L, 1, I)),
            "w2": nrm((L, I, H)).astype(jnp.bfloat16),
            "b2": zeros((L, 1, H)),
            "ln2_g": ones((L, 1, H)),
            "ln2_b": zeros((L, 1, H)),
        },
    }


def bert_encoder_forward(params, input_ids, cfg):
    """Returns last_hidden_state [B, S, H] — equivalent to BertModel(input_ids)[0]."""
    B, S = input_ids.shape
    H = cfg.hidden
    # Embedding gathers + adds stay in XLA (fuse with the gather); the
    # embedding LayerNorm runs inside the fused stack kernel at layer 0.
    word = jnp.take(params["word_emb"], input_ids, axis=0)        # (B, S, H)
    pos = params["pos_emb"][:S]                                   # (S, H)
    typ = params["type_emb"][0]                                   # (H,)  token_type_ids == 0
    emb = (word + pos[None, :, :] + typ[None, None, :]).reshape(B * S, H)
    out = bert_encoder_stack(emb, params["emb_ln_g"], params["emb_ln_b"],
                             params["stack"], num_heads=cfg.num_heads,
                             batch=B, seq=S)
    return out.reshape(B, S, H)


class BertEncoder:
    """Pallas equivalent of the reference BertEncoder (forward returns output[0])."""
    # TODO(synk): tokenizer / pretrained checkpoint loading has no Pallas
    # equivalent; weights are deterministic synthetic init instead.

    def __init__(self, max_length, use_amp=False, cfg=BertConfig()):
        self.max_length = max_length
        self.use_amp = use_amp   # autocast modeled as bf16 weights/MXU, fp32 elementwise
        self.cfg = cfg
        self.params = init_params(jax.random.PRNGKey(0), cfg)
        self._fwd = jax.jit(functools.partial(bert_encoder_forward, cfg=cfg))

    def __call__(self, input_ids):
        return self._fwd(self.params, input_ids)


# ---------------------------------- main --------------------------------------

if __name__ == "__main__":
    cfg = BertConfig()
    B, S = 2, 8
    key = jax.random.PRNGKey(0)
    input_ids = jax.random.randint(key, (B, S), 0, cfg.vocab_size, dtype=jnp.int32)

    enc = BertEncoder(max_length=S)
    out = enc(input_ids)
    out = jax.block_until_ready(out)

    assert out.shape == (B, S, cfg.hidden), out.shape
    assert out.dtype == jnp.float32
    assert bool(jnp.all(jnp.isfinite(out)))
    print("KERNEL_OK")
</pallas_src>

<mosaic_0001>
module attributes {stable_mosaic.version = 11 : i64} {
  func.func @bert_stack_kernel(%arg0: i32, %arg1: memref<16x32xf32, #tpu.memory_space<vmem>>, %arg2: memref<1x32xf32, #tpu.memory_space<vmem>>, %arg3: memref<1x32xf32, #tpu.memory_space<vmem>>, %arg4: memref<1x32x96xbf16, #tpu.memory_space<vmem>>, %arg5: memref<1x1x96xf32, #tpu.memory_space<vmem>>, %arg6: memref<1x32x32xbf16, #tpu.memory_space<vmem>>, %arg7: memref<1x1x32xf32, #tpu.memory_space<vmem>>, %arg8: memref<1x1x32xf32, #tpu.memory_space<vmem>>, %arg9: memref<1x1x32xf32, #tpu.memory_space<vmem>>, %arg10: memref<1x32x64xbf16, #tpu.memory_space<vmem>>, %arg11: memref<1x1x64xf32, #tpu.memory_space<vmem>>, %arg12: memref<1x64x32xbf16, #tpu.memory_space<vmem>>, %arg13: memref<1x1x32xf32, #tpu.memory_space<vmem>>, %arg14: memref<1x1x32xf32, #tpu.memory_space<vmem>>, %arg15: memref<1x1x32xf32, #tpu.memory_space<vmem>>, %arg16: memref<16x32xf32, #tpu.memory_space<vmem>>) attributes {dimension_semantics = [#tpu.dimension_semantics<arbitrary>], iteration_bounds = array<i64: 2>, scalar_prefetch = 0 : i64, scratch_operands = 0 : i64, tpu.core_type = #tpu.core_type<tc>, window_params = [{pipeline_mode = #tpu.pipeline_mode<synchronous>, transform_indices = @transform_0, window_bounds = array<i64: 16, 32>}, {pipeline_mode = #tpu.pipeline_mode<synchronous>, transform_indices = @transform_1, window_bounds = array<i64: 1, 32>}, {pipeline_mode = #tpu.pipeline_mode<synchronous>, transform_indices = @transform_2, window_bounds = array<i64: 1, 32>}, {transform_indices = @transform_3, window_bounds = array<i64: 1, 32, 96>}, {transform_indices = @transform_4, window_bounds = array<i64: 1, 1, 96>}, {transform_indices = @transform_5, window_bounds = array<i64: 1, 32, 32>}, {transform_indices = @transform_6, window_bounds = array<i64: 1, 1, 32>}, {transform_indices = @transform_7, window_bounds = array<i64: 1, 1, 32>}, {transform_indices = @transform_8, window_bounds = array<i64: 1, 1, 32>}, {transform_indices = @transform_9, window_bounds = array<i64: 1, 32, 64>}, {transform_indices = @transform_10, window_bounds = array<i64: 1, 1, 64>}, {transform_indices = @transform_11, window_bounds = array<i64: 1, 64, 32>}, {transform_indices = @transform_12, window_bounds = array<i64: 1, 1, 32>}, {transform_indices = @transform_13, window_bounds = array<i64: 1, 1, 32>}, {transform_indices = @transform_14, window_bounds = array<i64: 1, 1, 32>}, {pipeline_mode = #tpu.pipeline_mode<synchronous>, transform_indices = @transform_15, window_bounds = array<i64: 16, 32>}]} {
    %c0_i32 = arith.constant 0 : i32
    %0 = arith.cmpi eq, %arg0, %c0_i32 : i32
    %1 = arith.extui %0 : i1 to i32
    %c0_i32_0 = arith.constant 0 : i32
    %2 = arith.cmpi ne, %1, %c0_i32_0 : i32
    scf.if %2 {
      %c0_72 = arith.constant 0 : index
      %c0_73 = arith.constant 0 : index
      %195 = vector.load %arg1[%c0_72, %c0_73] : memref<16x32xf32, #tpu.memory_space<vmem>>, vector<16x32xf32>
      %c0_74 = arith.constant 0 : index
      %c0_75 = arith.constant 0 : index
      %196 = vector.load %arg2[%c0_74, %c0_75] : memref<1x32xf32, #tpu.memory_space<vmem>>, vector<1x32xf32>
      %c0_76 = arith.constant 0 : index
      %c0_77 = arith.constant 0 : index
      %197 = vector.load %arg3[%c0_76, %c0_77] : memref<1x32xf32, #tpu.memory_space<vmem>>, vector<1x32xf32>
      %cst_78 = arith.constant dense<0.000000e+00> : vector<16xf32>
      %198 = vector.multi_reduction <add>, %195, %cst_78 [1] : vector<16x32xf32> to vector<16xf32>
      %199 = vector.shape_cast %198 : vector<16xf32> to vector<16x1xf32>
      %cst_79 = arith.constant 3.200000e+01 : f32
      %200 = vector.broadcast %cst_79 : f32 to vector<16x1xf32>
      %201 = arith.divf %199, %200 : vector<16x1xf32>
      %202 = vector.broadcast %201 : vector<16x1xf32> to vector<16x32xf32>
      %203 = arith.subf %195, %202 : vector<16x32xf32>
      %204 = arith.mulf %203, %203 : vector<16x32xf32>
      %cst_80 = arith.constant dense<0.000000e+00> : vector<16xf32>
      %205 = vector.multi_reduction <add>, %204, %cst_80 [1] : vector<16x32xf32> to vector<16xf32>
      %206 = vector.shape_cast %205 : vector<16xf32> to vector<16x1xf32>
      %cst_81 = arith.constant 3.200000e+01 : f32
      %207 = vector.broadcast %cst_81 : f32 to vector<16x1xf32>
      %208 = arith.divf %206, %207 : vector<16x1xf32>
      %209 = vector.broadcast %201 : vector<16x1xf32> to vector<16x32xf32>
      %210 = arith.subf %195, %209 : vector<16x32xf32>
      %cst_82 = arith.constant 9.99999996E-13 : f32
      %211 = vector.broadcast %cst_82 : f32 to vector<16x1xf32>
      %212 = arith.addf %208, %211 : vector<16x1xf32>
      %213 = math.rsqrt %212 : vector<16x1xf32>
      %214 = vector.broadcast %213 : vector<16x1xf32> to vector<16x32xf32>
      %215 = arith.mulf %210, %214 : vector<16x32xf32>
      %216 = vector.broadcast %196 : vector<1x32xf32> to vector<16x32xf32>
      %217 = arith.mulf %215, %216 : vector<16x32xf32>
      %218 = vector.broadcast %197 : vector<1x32xf32> to vector<16x32xf32>
      %219 = arith.addf %217, %218 : vector<16x32xf32>
      %c0_83 = arith.constant 0 : index
      %c0_84 = arith.constant 0 : index
      %220 = vector.load %arg16[%c0_83, %c0_84] : memref<16x32xf32, #tpu.memory_space<vmem>>, vector<16x32xf32>
      tpu.vector_store %arg16[%c0_83, %c0_84], %219 {strides = array<i32>} : memref<16x32xf32, #tpu.memory_space<vmem>>, vector<16x32xf32>,
    } else {
    }
    %c0 = arith.constant 0 : index
    %c0_1 = arith.constant 0 : index
    %3 = vector.load %arg16[%c0, %c0_1] : memref<16x32xf32, #tpu.memory_space<vmem>>, vector<16x32xf32>
    %c0_2 = arith.constant 0 : index
    %c0_3 = arith.constant 0 : index
    %c0_4 = arith.constant 0 : index
    %4 = vector.load %arg4[%c0_2, %c0_3, %c0_4] : memref<1x32x96xbf16, #tpu.memory_space<vmem>>, vector<1x32x96xbf16>
    %5 = vector.shape_cast %4 : vector<1x32x96xbf16> to vector<32x96xbf16>
    %6 = arith.truncf %3 : vector<16x32xf32> to vector<16x32xbf16>
    %cst = arith.constant dense<0.000000e+00> : vector<16x96xf32>
    %7 = tpu.matmul %6, %5, %cst {dimension_numbers = #tpu.dot_dimension_numbers<[1], [0], [0], [1], [0, 0, 1, 1], [], []>} : vector<16x32xbf16>, vector<32x96xbf16>, vector<16x96xf32> -> vector<16x96xf32>
    %c0_5 = arith.constant 0 : index
    %c0_6 = arith.constant 0 : index
    %c0_7 = arith.constant 0 : index
    %8 = vector.load %arg5[%c0_5, %c0_6, %c0_7] : memref<1x1x96xf32, #tpu.memory_space<vmem>>, vector<1x1x96xf32>
    %9 = vector.shape_cast %8 : vector<1x1x96xf32> to vector<1x96xf32>
    %10 = vector.broadcast %9 : vector<1x96xf32> to vector<16x96xf32>
    %11 = arith.addf %7, %10 : vector<16x96xf32>
    %12 = vector.extract_strided_slice %11 {offsets = [0, 0], sizes = [16, 32], strides = [1, 1]} : vector<16x96xf32> to vector<16x32xf32>
    %13 = vector.extract_strided_slice %11 {offsets = [0, 32], sizes = [16, 32], strides = [1, 1]} : vector<16x96xf32> to vector<16x32xf32>
    %14 = vector.extract_strided_slice %11 {offsets = [0, 64], sizes = [16, 32], strides = [1, 1]} : vector<16x96xf32> to vector<16x32xf32>
    %15 = vector.extract_strided_slice %12 {offsets = [0, 0], sizes = [16, 8], strides = [1, 1]} : vector<16x32xf32> to vector<16x8xf32>
    %16 = vector.shape_cast %15 : vector<16x8xf32> to vector<2x8x8xf32>
    %17 = arith.truncf %16 : vector<2x8x8xf32> to vector<2x8x8xbf16>
    %18 = vector.extract_strided_slice %13 {offsets = [0, 0], sizes = [16, 8], strides = [1, 1]} : vector<16x32xf32> to vector<16x8xf32>
    %19 = vector.shape_cast %18 : vector<16x8xf32> to vector<2x8x8xf32>
    %20 = arith.truncf %19 : vector<2x8x8xf32> to vector<2x8x8xbf16>
    %21 = vector.extract_strided_slice %14 {offsets = [0, 0], sizes = [16, 8], strides = [1, 1]} : vector<16x32xf32> to vector<16x8xf32>
    %22 = vector.shape_cast %21 : vector<16x8xf32> to vector<2x8x8xf32>
    %23 = arith.truncf %22 : vector<2x8x8xf32> to vector<2x8x8xbf16>
    "tpu.trace_start"() <{level = 10 : i32, message = "bqd,bkd->bqk"}> : () -> ()
    %cst_8 = arith.constant dense<0.000000e+00> : vector<2x8x8xf32>
    %24 = tpu.matmul %17, %20, %cst_8 {dimension_numbers = #tpu.dot_dimension_numbers<[2], [2], [1], [1], [0, 0, 0, 1, 1, 1], [0], [0]>} : vector<2x8x8xbf16>, vector<2x8x8xbf16>, vector<2x8x8xf32> -> vector<2x8x8xf32>
    "tpu.trace_stop"() : () -> ()
    %cst_9 = arith.constant dense<0xFF800000> : vector<2x8xf32>
    %25 = vector.multi_reduction <maximumf>, %24, %cst_9 [2] : vector<2x8x8xf32> to vector<2x8xf32>
    %26 = vector.shape_cast %25 : vector<2x8xf32> to vector<2x8x1xf32>
    %27 = vector.broadcast %26 : vector<2x8x1xf32> to vector<2x8x8xf32>
    %28 = arith.subf %24, %27 : vector<2x8x8xf32>
    %29 = math.exp %28 : vector<2x8x8xf32>
    %cst_10 = arith.constant dense<0.000000e+00> : vector<2x8xf32>
    %30 = vector.multi_reduction <add>, %29, %cst_10 [2] : vector<2x8x8xf32> to vector<2x8xf32>
    %31 = vector.shape_cast %30 : vector<2x8xf32> to vector<2x8x1xf32>
    %32 = tpu.reciprocal %31 {approx = true} : vector<2x8x1xf32> -> vector<2x8x1xf32>
    %33 = vector.broadcast %32 : vector<2x8x1xf32> to vector<2x8x8xf32>
    %34 = arith.mulf %29, %33 : vector<2x8x8xf32>
    %35 = arith.truncf %34 : vector<2x8x8xf32> to vector<2x8x8xbf16>
    "tpu.trace_start"() <{level = 10 : i32, message = "bqk,bkd->bqd"}> : () -> ()
    %cst_11 = arith.constant dense<0.000000e+00> : vector<2x8x8xf32>
    %36 = tpu.matmul %35, %23, %cst_11 {dimension_numbers = #tpu.dot_dimension_numbers<[2], [1], [1], [2], [0, 0, 0, 1, 1, 2], [0], [0]>} : vector<2x8x8xbf16>, vector<2x8x8xbf16>, vector<2x8x8xf32> -> vector<2x8x8xf32>
    "tpu.trace_stop"() : () -> ()
    %37 = vector.shape_cast %36 : vector<2x8x8xf32> to vector<16x8xf32>
    %38 = vector.extract_strided_slice %12 {offsets = [0, 8], sizes = [16, 8], strides = [1, 1]} : vector<16x32xf32> to vector<16x8xf32>
    %39 = vector.shape_cast %38 : vector<16x8xf32> to vector<2x8x8xf32>
    %40 = arith.truncf %39 : vector<2x8x8xf32> to vector<2x8x8xbf16>
    %41 = vector.extract_strided_slice %13 {offsets = [0, 8], sizes = [16, 8], strides = [1, 1]} : vector<16x32xf32> to vector<16x8xf32>
    %42 = vector.shape_cast %41 : vector<16x8xf32> to vector<2x8x8xf32>
    %43 = arith.truncf %42 : vector<2x8x8xf32> to vector<2x8x8xbf16>
    %44 = vector.extract_strided_slice %14 {offsets = [0, 8], sizes = [16, 8], strides = [1, 1]} : vector<16x32xf32> to vector<16x8xf32>
    %45 = vector.shape_cast %44 : vector<16x8xf32> to vector<2x8x8xf32>
    %46 = arith.truncf %45 : vector<2x8x8xf32> to vector<2x8x8xbf16>
    "tpu.trace_start"() <{level = 10 : i32, message = "bqd,bkd->bqk"}> : () -> ()
    %cst_12 = arith.constant dense<0.000000e+00> : vector<2x8x8xf32>
    %47 = tpu.matmul %40, %43, %cst_12 {dimension_numbers = #tpu.dot_dimension_numbers<[2], [2], [1], [1], [0, 0, 0, 1, 1, 1], [0], [0]>} : vector<2x8x8xbf16>, vector<2x8x8xbf16>, vector<2x8x8xf32> -> vector<2x8x8xf32>
    "tpu.trace_stop"() : () -> ()
    %cst_13 = arith.constant dense<0xFF800000> : vector<2x8xf32>
    %48 = vector.multi_reduction <maximumf>, %47, %cst_13 [2] : vector<2x8x8xf32> to vector<2x8xf32>
    %49 = vector.shape_cast %48 : vector<2x8xf32> to vector<2x8x1xf32>
    %50 = vector.broadcast %49 : vector<2x8x1xf32> to vector<2x8x8xf32>
    %51 = arith.subf %47, %50 : vector<2x8x8xf32>
    %52 = math.exp %51 : vector<2x8x8xf32>
    %cst_14 = arith.constant dense<0.000000e+00> : vector<2x8xf32>
    %53 = vector.multi_reduction <add>, %52, %cst_14 [2] : vector<2x8x8xf32> to vector<2x8xf32>
    %54 = vector.shape_cast %53 : vector<2x8xf32> to vector<2x8x1xf32>
    %55 = tpu.reciprocal %54 {approx = true} : vector<2x8x1xf32> -> vector<2x8x1xf32>
    %56 = vector.broadcast %55 : vector<2x8x1xf32> to vector<2x8x8xf32>
    %57 = arith.mulf %52, %56 : vector<2x8x8xf32>
    %58 = arith.truncf %57 : vector<2x8x8xf32> to vector<2x8x8xbf16>
    "tpu.trace_start"() <{level = 10 : i32, message = "bqk,bkd->bqd"}> : () -> ()
    %cst_15 = arith.constant dense<0.000000e+00> : vector<2x8x8xf32>
    %59 = tpu.matmul %58, %46, %cst_15 {dimension_numbers = #tpu.dot_dimension_numbers<[2], [1], [1], [2], [0, 0, 0, 1, 1, 2], [0], [0]>} : vector<2x8x8xbf16>, vector<2x8x8xbf16>, vector<2x8x8xf32> -> vector<2x8x8xf32>
    "tpu.trace_stop"() : () -> ()
    %60 = vector.shape_cast %59 : vector<2x8x8xf32> to vector<16x8xf32>
    %61 = vector.extract_strided_slice %12 {offsets = [0, 16], sizes = [16, 8], strides = [1, 1]} : vector<16x32xf32> to vector<16x8xf32>
    %62 = vector.shape_cast %61 : vector<16x8xf32> to vector<2x8x8xf32>
    %63 = arith.truncf %62 : vector<2x8x8xf32> to vector<2x8x8xbf16>
    %64 = vector.extract_strided_slice %13 {offsets = [0, 16], sizes = [16, 8], strides = [1, 1]} : vector<16x32xf32> to vector<16x8xf32>
    %65 = vector.shape_cast %64 : vector<16x8xf32> to vector<2x8x8xf32>
    %66 = arith.truncf %65 : vector<2x8x8xf32> to vector<2x8x8xbf16>
    %67 = vector.extract_strided_slice %14 {offsets = [0, 16], sizes = [16, 8], strides = [1, 1]} : vector<16x32xf32> to vector<16x8xf32>
    %68 = vector.shape_cast %67 : vector<16x8xf32> to vector<2x8x8xf32>
    %69 = arith.truncf %68 : vector<2x8x8xf32> to vector<2x8x8xbf16>
    "tpu.trace_start"() <{level = 10 : i32, message = "bqd,bkd->bqk"}> : () -> ()
    %cst_16 = arith.constant dense<0.000000e+00> : vector<2x8x8xf32>
    %70 = tpu.matmul %63, %66, %cst_16 {dimension_numbers = #tpu.dot_dimension_numbers<[2], [2], [1], [1], [0, 0, 0, 1, 1, 1], [0], [0]>} : vector<2x8x8xbf16>, vector<2x8x8xbf16>, vector<2x8x8xf32> -> vector<2x8x8xf32>
    "tpu.trace_stop"() : () -> ()
    %cst_17 = arith.constant dense<0xFF800000> : vector<2x8xf32>
    %71 = vector.multi_reduction <maximumf>, %70, %cst_17 [2] : vector<2x8x8xf32> to vector<2x8xf32>
    %72 = vector.shape_cast %71 : vector<2x8xf32> to vector<2x8x1xf32>
    %73 = vector.broadcast %72 : vector<2x8x1xf32> to vector<2x8x8xf32>
    %74 = arith.subf %70, %73 : vector<2x8x8xf32>
    %75 = math.exp %74 : vector<2x8x8xf32>
    %cst_18 = arith.constant dense<0.000000e+00> : vector<2x8xf32>
    %76 = vector.multi_reduction <add>, %75, %cst_18 [2] : vector<2x8x8xf32> to vector<2x8xf32>
    %77 = vector.shape_cast %76 : vector<2x8xf32> to vector<2x8x1xf32>
    %78 = tpu.reciprocal %77 {approx = true} : vector<2x8x1xf32> -> vector<2x8x1xf32>
    %79 = vector.broadcast %78 : vector<2x8x1xf32> to vector<2x8x8xf32>
    %80 = arith.mulf %75, %79 : vector<2x8x8xf32>
    %81 = arith.truncf %80 : vector<2x8x8xf32> to vector<2x8x8xbf16>
    "tpu.trace_start"() <{level = 10 : i32, message = "bqk,bkd->bqd"}> : () -> ()
    %cst_19 = arith.constant dense<0.000000e+00> : vector<2x8x8xf32>
    %82 = tpu.matmul %81, %69, %cst_19 {dimension_numbers = #tpu.dot_dimension_numbers<[2], [1], [1], [2], [0, 0, 0, 1, 1, 2], [0], [0]>} : vector<2x8x8xbf16>, vector<2x8x8xbf16>, vector<2x8x8xf32> -> vector<2x8x8xf32>
    "tpu.trace_stop"() : () -> ()
    %83 = vector.shape_cast %82 : vector<2x8x8xf32> to vector<16x8xf32>
    %84 = vector.extract_strided_slice %12 {offsets = [0, 24], sizes = [16, 8], strides = [1, 1]} : vector<16x32xf32> to vector<16x8xf32>
    %85 = vector.shape_cast %84 : vector<16x8xf32> to vector<2x8x8xf32>
    %86 = arith.truncf %85 : vector<2x8x8xf32> to vector<2x8x8xbf16>
    %87 = vector.extract_strided_slice %13 {offsets = [0, 24], sizes = [16, 8], strides = [1, 1]} : vector<16x32xf32> to vector<16x8xf32>
    %88 = vector.shape_cast %87 : vector<16x8xf32> to vector<2x8x8xf32>
    %89 = arith.truncf %88 : vector<2x8x8xf32> to vector<2x8x8xbf16>
    %90 = vector.extract_strided_slice %14 {offsets = [0, 24], sizes = [16, 8], strides = [1, 1]} : vector<16x32xf32> to vector<16x8xf32>
    %91 = vector.shape_cast %90 : vector<16x8xf32> to vector<2x8x8xf32>
    %92 = arith.truncf %91 : vector<2x8x8xf32> to vector<2x8x8xbf16>
    "tpu.trace_start"() <{level = 10 : i32, message = "bqd,bkd->bqk"}> : () -> ()
    %cst_20 = arith.constant dense<0.000000e+00> : vector<2x8x8xf32>
    %93 = tpu.matmul %86, %89, %cst_20 {dimension_numbers = #tpu.dot_dimension_numbers<[2], [2], [1], [1], [0, 0, 0, 1, 1, 1], [0], [0]>} : vector<2x8x8xbf16>, vector<2x8x8xbf16>, vector<2x8x8xf32> -> vector<2x8x8xf32>
    "tpu.trace_stop"() : () -> ()
    %cst_21 = arith.constant dense<0xFF800000> : vector<2x8xf32>
    %94 = vector.multi_reduction <maximumf>, %93, %cst_21 [2] : vector<2x8x8xf32> to vector<2x8xf32>
    %95 = vector.shape_cast %94 : vector<2x8xf32> to vector<2x8x1xf32>
    %96 = vector.broadcast %95 : vector<2x8x1xf32> to vector<2x8x8xf32>
    %97 = arith.subf %93, %96 : vector<2x8x8xf32>
    %98 = math.exp %97 : vector<2x8x8xf32>
    %cst_22 = arith.constant dense<0.000000e+00> : vector<2x8xf32>
    %99 = vector.multi_reduction <add>, %98, %cst_22 [2] : vector<2x8x8xf32> to vector<2x8xf32>
    %100 = vector.shape_cast %99 : vector<2x8xf32> to vector<2x8x1xf32>
    %101 = tpu.reciprocal %100 {approx = true} : vector<2x8x1xf32> -> vector<2x8x1xf32>
    %102 = vector.broadcast %101 : vector<2x8x1xf32> to vector<2x8x8xf32>
    %103 = arith.mulf %98, %102 : vector<2x8x8xf32>
    %104 = arith.truncf %103 : vector<2x8x8xf32> to vector<2x8x8xbf16>
    "tpu.trace_start"() <{level = 10 : i32, message = "bqk,bkd->bqd"}> : () -> ()
    %cst_23 = arith.constant dense<0.000000e+00> : vector<2x8x8xf32>
    %105 = tpu.matmul %104, %92, %cst_23 {dimension_numbers = #tpu.dot_dimension_numbers<[2], [1], [1], [2], [0, 0, 0, 1, 1, 2], [0], [0]>} : vector<2x8x8xbf16>, vector<2x8x8xbf16>, vector<2x8x8xf32> -> vector<2x8x8xf32>
    "tpu.trace_stop"() : () -> ()
    %106 = vector.shape_cast %105 : vector<2x8x8xf32> to vector<16x8xf32>
    %107 = tpu.concatenate %37, %60, %83, %106 in 1 : vector<16x8xf32>, vector<16x8xf32>, vector<16x8xf32>, vector<16x8xf32> -> vector<16x32xf32>
    %c0_24 = arith.constant 0 : index
    %c0_25 = arith.constant 0 : index
    %c0_26 = arith.constant 0 : index
    %108 = vector.load %arg6[%c0_24, %c0_25, %c0_26] : memref<1x32x32xbf16, #tpu.memory_space<vmem>>, vector<1x32x32xbf16>
    %109 = vector.shape_cast %108 : vector<1x32x32xbf16> to vector<32x32xbf16>
    %110 = arith.truncf %107 : vector<16x32xf32> to vector<16x32xbf16>
    %cst_27 = arith.constant dense<0.000000e+00> : vector<16x32xf32>
    %111 = tpu.matmul %110, %109, %cst_27 {dimension_numbers = #tpu.dot_dimension_numbers<[1], [0], [0], [1], [0, 0, 1, 1], [], []>} : vector<16x32xbf16>, vector<32x32xbf16>, vector<16x32xf32> -> vector<16x32xf32>
    %c0_28 = arith.constant 0 : index
    %c0_29 = arith.constant 0 : index
    %c0_30 = arith.constant 0 : index
    %112 = vector.load %arg7[%c0_28, %c0_29, %c0_30] : memref<1x1x32xf32, #tpu.memory_space<vmem>>, vector<1x1x32xf32>
    %113 = vector.shape_cast %112 : vector<1x1x32xf32> to vector<1x32xf32>
    %114 = vector.broadcast %113 : vector<1x32xf32> to vector<16x32xf32>
    %115 = arith.addf %111, %114 : vector<16x32xf32>
    %116 = arith.addf %3, %115 : vector<16x32xf32>
    %c0_31 = arith.constant 0 : index
    %c0_32 = arith.constant 0 : index
    %c0_33 = arith.constant 0 : index
    %117 = vector.load %arg8[%c0_31, %c0_32, %c0_33] : memref<1x1x32xf32, #tpu.memory_space<vmem>>, vector<1x1x32xf32>
    %118 = vector.shape_cast %117 : vector<1x1x32xf32> to vector<1x32xf32>
    %c0_34 = arith.constant 0 : index
    %c0_35 = arith.constant 0 : index
    %c0_36 = arith.constant 0 : index
    %119 = vector.load %arg9[%c0_34, %c0_35, %c0_36] : memref<1x1x32xf32, #tpu.memory_space<vmem>>, vector<1x1x32xf32>
    %120 = vector.shape_cast %119 : vector<1x1x32xf32> to vector<1x32xf32>
    %cst_37 = arith.constant dense<0.000000e+00> : vector<16xf32>
    %121 = vector.multi_reduction <add>, %116, %cst_37 [1] : vector<16x32xf32> to vector<16xf32>
    %122 = vector.shape_cast %121 : vector<16xf32> to vector<16x1xf32>
    %cst_38 = arith.constant 3.200000e+01 : f32
    %123 = vector.broadcast %cst_38 : f32 to vector<16x1xf32>
    %124 = arith.divf %122, %123 : vector<16x1xf32>
    %125 = vector.broadcast %124 : vector<16x1xf32> to vector<16x32xf32>
    %126 = arith.subf %116, %125 : vector<16x32xf32>
    %127 = arith.mulf %126, %126 : vector<16x32xf32>
    %cst_39 = arith.constant dense<0.000000e+00> : vector<16xf32>
    %128 = vector.multi_reduction <add>, %127, %cst_39 [1] : vector<16x32xf32> to vector<16xf32>
    %129 = vector.shape_cast %128 : vector<16xf32> to vector<16x1xf32>
    %cst_40 = arith.constant 3.200000e+01 : f32
    %130 = vector.broadcast %cst_40 : f32 to vector<16x1xf32>
    %131 = arith.divf %129, %130 : vector<16x1xf32>
    %132 = vector.broadcast %124 : vector<16x1xf32> to vector<16x32xf32>
    %133 = arith.subf %116, %132 : vector<16x32xf32>
    %cst_41 = arith.constant 9.99999996E-13 : f32
    %134 = vector.broadcast %cst_41 : f32 to vector<16x1xf32>
    %135 = arith.addf %131, %134 : vector<16x1xf32>
    %136 = math.rsqrt %135 : vector<16x1xf32>
    %137 = vector.broadcast %136 : vector<16x1xf32> to vector<16x32xf32>
    %138 = arith.mulf %133, %137 : vector<16x32xf32>
    %139 = vector.broadcast %118 : vector<1x32xf32> to vector<16x32xf32>
    %140 = arith.mulf %138, %139 : vector<16x32xf32>
    %141 = vector.broadcast %120 : vector<1x32xf32> to vector<16x32xf32>
    %142 = arith.addf %140, %141 : vector<16x32xf32>
    %c0_42 = arith.constant 0 : index
    %c0_43 = arith.constant 0 : index
    %c0_44 = arith.constant 0 : index
    %143 = vector.load %arg10[%c0_42, %c0_43, %c0_44] : memref<1x32x64xbf16, #tpu.memory_space<vmem>>, vector<1x32x64xbf16>
    %144 = vector.shape_cast %143 : vector<1x32x64xbf16> to vector<32x64xbf16>
    %145 = arith.truncf %142 : vector<16x32xf32> to vector<16x32xbf16>
    %cst_45 = arith.constant dense<0.000000e+00> : vector<16x64xf32>
    %146 = tpu.matmul %145, %144, %cst_45 {dimension_numbers = #tpu.dot_dimension_numbers<[1], [0], [0], [1], [0, 0, 1, 1], [], []>} : vector<16x32xbf16>, vector<32x64xbf16>, vector<16x64xf32> -> vector<16x64xf32>
    %c0_46 = arith.constant 0 : index
    %c0_47 = arith.constant 0 : index
    %c0_48 = arith.constant 0 : index
    %147 = vector.load %arg11[%c0_46, %c0_47, %c0_48] : memref<1x1x64xf32, #tpu.memory_space<vmem>>, vector<1x1x64xf32>
    %148 = vector.shape_cast %147 : vector<1x1x64xf32> to vector<1x64xf32>
    %149 = vector.broadcast %148 : vector<1x64xf32> to vector<16x64xf32>
    %150 = arith.addf %146, %149 : vector<16x64xf32>
    %cst_49 = arith.constant 5.000000e-01 : f32
    %151 = vector.broadcast %cst_49 : f32 to vector<16x64xf32>
    %152 = arith.mulf %151, %150 : vector<16x64xf32>
    %cst_50 = arith.constant 0.707106769 : f32
    %153 = vector.broadcast %cst_50 : f32 to vector<16x64xf32>
    %154 = arith.mulf %150, %153 : vector<16x64xf32>
    %155 = math.erf %154 : vector<16x64xf32>
    %cst_51 = arith.constant 1.000000e+00 : f32
    %156 = vector.broadcast %cst_51 : f32 to vector<16x64xf32>
    %157 = arith.addf %156, %155 : vector<16x64xf32>
    %158 = arith.mulf %152, %157 : vector<16x64xf32>
    %c0_52 = arith.constant 0 : index
    %c0_53 = arith.constant 0 : index
    %c0_54 = arith.constant 0 : index
    %159 = vector.load %arg12[%c0_52, %c0_53, %c0_54] : memref<1x64x32xbf16, #tpu.memory_space<vmem>>, vector<1x64x32xbf16>
    %160 = vector.shape_cast %159 : vector<1x64x32xbf16> to vector<64x32xbf16>
    %161 = arith.truncf %158 : vector<16x64xf32> to vector<16x64xbf16>
    %cst_55 = arith.constant dense<0.000000e+00> : vector<16x32xf32>
    %162 = tpu.matmul %161, %160, %cst_55 {dimension_numbers = #tpu.dot_dimension_numbers<[1], [0], [0], [1], [0, 0, 1, 1], [], []>} : vector<16x64xbf16>, vector<64x32xbf16>, vector<16x32xf32> -> vector<16x32xf32>
    %c0_56 = arith.constant 0 : index
    %c0_57 = arith.constant 0 : index
    %c0_58 = arith.constant 0 : index
    %163 = vector.load %arg13[%c0_56, %c0_57, %c0_58] : memref<1x1x32xf32, #tpu.memory_space<vmem>>, vector<1x1x32xf32>
    %164 = vector.shape_cast %163 : vector<1x1x32xf32> to vector<1x32xf32>
    %165 = vector.broadcast %164 : vector<1x32xf32> to vector<16x32xf32>
    %166 = arith.addf %162, %165 : vector<16x32xf32>
    %167 = arith.addf %142, %166 : vector<16x32xf32>
    %c0_59 = arith.constant 0 : index
    %c0_60 = arith.constant 0 : index
    %c0_61 = arith.constant 0 : index
    %168 = vector.load %arg14[%c0_59, %c0_60, %c0_61] : memref<1x1x32xf32, #tpu.memory_space<vmem>>, vector<1x1x32xf32>
    %169 = vector.shape_cast %168 : vector<1x1x32xf32> to vector<1x32xf32>
    %c0_62 = arith.constant 0 : index
    %c0_63 = arith.constant 0 : index
    %c0_64 = arith.constant 0 : index
    %170 = vector.load %arg15[%c0_62, %c0_63, %c0_64] : memref<1x1x32xf32, #tpu.memory_space<vmem>>, vector<1x1x32xf32>
    %171 = vector.shape_cast %170 : vector<1x1x32xf32> to vector<1x32xf32>
    %cst_65 = arith.constant dense<0.000000e+00> : vector<16xf32>
    %172 = vector.multi_reduction <add>, %167, %cst_65 [1] : vector<16x32xf32> to vector<16xf32>
    %173 = vector.shape_cast %172 : vector<16xf32> to vector<16x1xf32>
    %cst_66 = arith.constant 3.200000e+01 : f32
    %174 = vector.broadcast %cst_66 : f32 to vector<16x1xf32>
    %175 = arith.divf %173, %174 : vector<16x1xf32>
    %176 = vector.broadcast %175 : vector<16x1xf32> to vector<16x32xf32>
    %177 = arith.subf %167, %176 : vector<16x32xf32>
    %178 = arith.mulf %177, %177 : vector<16x32xf32>
    %cst_67 = arith.constant dense<0.000000e+00> : vector<16xf32>
    %179 = vector.multi_reduction <add>, %178, %cst_67 [1] : vector<16x32xf32> to vector<16xf32>
    %180 = vector.shape_cast %179 : vector<16xf32> to vector<16x1xf32>
    %cst_68 = arith.constant 3.200000e+01 : f32
    %181 = vector.broadcast %cst_68 : f32 to vector<16x1xf32>
    %182 = arith.divf %180, %181 : vector<16x1xf32>
    %183 = vector.broadcast %175 : vector<16x1xf32> to vector<16x32xf32>
    %184 = arith.subf %167, %183 : vector<16x32xf32>
    %cst_69 = arith.constant 9.99999996E-13 : f32
    %185 = vector.broadcast %cst_69 : f32 to vector<16x1xf32>
    %186 = arith.addf %182, %185 : vector<16x1xf32>
    %187 = math.rsqrt %186 : vector<16x1xf32>
    %188 = vector.broadcast %187 : vector<16x1xf32> to vector<16x32xf32>
    %189 = arith.mulf %184, %188 : vector<16x32xf32>
    %190 = vector.broadcast %169 : vector<1x32xf32> to vector<16x32xf32>
    %191 = arith.mulf %189, %190 : vector<16x32xf32>
    %192 = vector.broadcast %171 : vector<1x32xf32> to vector<16x32xf32>
    %193 = arith.addf %191, %192 : vector<16x32xf32>
    %c0_70 = arith.constant 0 : index
    %c0_71 = arith.constant 0 : index
    %194 = vector.load %arg16[%c0_70, %c0_71] : memref<16x32xf32, #tpu.memory_space<vmem>>, vector<16x32xf32>
    tpu.vector_store %arg16[%c0_70, %c0_71], %193 {strides = array<i32>} : memref<16x32xf32, #tpu.memory_space<vmem>>, vector<16x32xf32>,
    return
  }
  func.func @transform_0(%arg0: i32) -> (i32, i32) {
    %c0_i32 = arith.constant 0 : i32
    %c0_i32_0 = arith.constant 0 : i32
    %c0_i32_1 = arith.constant 0 : i32
    return %c0_i32, %c0_i32_0 : i32, i32
  }
  func.func @transform_1(%arg0: i32) -> (i32, i32) {
    %c0_i32 = arith.constant 0 : i32
    %c0_i32_0 = arith.constant 0 : i32
    %c0_i32_1 = arith.constant 0 : i32
    return %c0_i32, %c0_i32_0 : i32, i32
  }
  func.func @transform_2(%arg0: i32) -> (i32, i32) {
    %c0_i32 = arith.constant 0 : i32
    %c0_i32_0 = arith.constant 0 : i32
    %c0_i32_1 = arith.constant 0 : i32
    return %c0_i32, %c0_i32_0 : i32, i32
  }
  func.func @transform_3(%arg0: i32) -> (i32, i32, i32) {
    %c0_i32 = arith.constant 0 : i32
    %c0_i32_0 = arith.constant 0 : i32
    %c0_i32_1 = arith.constant 0 : i32
    return %arg0, %c0_i32, %c0_i32_0 : i32, i32, i32
  }
  func.func @transform_4(%arg0: i32) -> (i32, i32, i32) {
    %c0_i32 = arith.constant 0 : i32
    %c0_i32_0 = arith.constant 0 : i32
    %c0_i32_1 = arith.constant 0 : i32
    return %arg0, %c0_i32, %c0_i32_0 : i32, i32, i32
  }
  func.func @transform_5(%arg0: i32) -> (i32, i32, i32) {
    %c0_i32 = arith.constant 0 : i32
    %c0_i32_0 = arith.constant 0 : i32
    %c0_i32_1 = arith.constant 0 : i32
    return %arg0, %c0_i32, %c0_i32_0 : i32, i32, i32
  }
  func.func @transform_6(%arg0: i32) -> (i32, i32, i32) {
    %c0_i32 = arith.constant 0 : i32
    %c0_i32_0 = arith.constant 0 : i32
    %c0_i32_1 = arith.constant 0 : i32
    return %arg0, %c0_i32, %c0_i32_0 : i32, i32, i32
  }
  func.func @transform_7(%arg0: i32) -> (i32, i32, i32) {
    %c0_i32 = arith.constant 0 : i32
    %c0_i32_0 = arith.constant 0 : i32
    %c0_i32_1 = arith.constant 0 : i32
    return %arg0, %c0_i32, %c0_i32_0 : i32, i32, i32
  }
  func.func @transform_8(%arg0: i32) -> (i32, i32, i32) {
    %c0_i32 = arith.constant 0 : i32
    %c0_i32_0 = arith.constant 0 : i32
    %c0_i32_1 = arith.constant 0 : i32
    return %arg0, %c0_i32, %c0_i32_0 : i32, i32, i32
  }
  func.func @transform_9(%arg0: i32) -> (i32, i32, i32) {
    %c0_i32 = arith.constant 0 : i32
    %c0_i32_0 = arith.constant 0 : i32
    %c0_i32_1 = arith.constant 0 : i32
    return %arg0, %c0_i32, %c0_i32_0 : i32, i32, i32
  }
  func.func @transform_10(%arg0: i32) -> (i32, i32, i32) {
    %c0_i32 = arith.constant 0 : i32
    %c0_i32_0 = arith.constant 0 : i32
    %c0_i32_1 = arith.constant 0 : i32
    return %arg0, %c0_i32, %c0_i32_0 : i32, i32, i32
  }
  func.func @transform_11(%arg0: i32) -> (i32, i32, i32) {
    %c0_i32 = arith.constant 0 : i32
    %c0_i32_0 = arith.constant 0 : i32
    %c0_i32_1 = arith.constant 0 : i32
    return %arg0, %c0_i32, %c0_i32_0 : i32, i32, i32
  }
  func.func @transform_12(%arg0: i32) -> (i32, i32, i32) {
    %c0_i32 = arith.constant 0 : i32
    %c0_i32_0 = arith.constant 0 : i32
    %c0_i32_1 = arith.constant 0 : i32
    return %arg0, %c0_i32, %c0_i32_0 : i32, i32, i32
  }
  func.func @transform_13(%arg0: i32) -> (i32, i32, i32) {
    %c0_i32 = arith.constant 0 : i32
    %c0_i32_0 = arith.constant 0 : i32
    %c0_i32_1 = arith.constant 0 : i32
    return %arg0, %c0_i32, %c0_i32_0 : i32, i32, i32
  }
  func.func @transform_14(%arg0: i32) -> (i32, i32, i32) {
    %c0_i32 = arith.constant 0 : i32
    %c0_i32_0 = arith.constant 0 : i32
    %c0_i32_1 = arith.constant 0 : i32
    return %arg0, %c0_i32, %c0_i32_0 : i32, i32, i32
  }
  func.func @transform_15(%arg0: i32) -> (i32, i32) {
    %c0_i32 = arith.constant 0 : i32
    %c0_i32_0 = arith.constant 0 : i32
    %c0_i32_1 = arith.constant 0 : i32
    return %c0_i32, %c0_i32_0 : i32, i32
  }
}

</mosaic_0001>

<bundles_post_ra>
// kernel: bert_encoder_forward.1
= control target key start
LH: loop header
LB: loop body
LE: loop exit
PB: predicated region body
PF: predicated region fallthrough
CT: control target
= control target key end

     0   :  { %s3000_s0 = inlined_call_operand.vmem [shape: f32[16,32], index: 0, kind: input, shape index: {}]   ;;  %s3001_s1 = inlined_call_operand.vmem [shape: f32[1,32], index: 1, kind: input, shape index: {}]   ;;  %s3002_s2 = inlined_call_operand.vmem [shape: f32[1,32], index: 2, kind: input, shape index: {}]   ;;  %s3003_s3 = inlined_call_operand.vmem [shape: bf16[2,32,96], index: 3, kind: input, shape index: {}]   ;;  %s3004_s4 = inlined_call_operand.vmem [shape: f32[2,1,96], index: 4, kind: input, shape index: {}]   ;;  %s3005_s5 = inlined_call_operand.vmem [shape: bf16[2,32,32], index: 5, kind: input, shape index: {}]   ;;  %s3006_s6 = inlined_call_operand.vmem [shape: f32[2,1,32], index: 6, kind: input, shape index: {}]   ;;  %s3007_s7 = inlined_call_operand.vmem [shape: f32[2,1,32], index: 7, kind: input, shape index: {}]   ;;  %s3008_s8 = inlined_call_operand.vmem [shape: f32[2,1,32], index: 8, kind: input, shape index: {}]   ;;  %s3009_s9 = inlined_call_operand.vmem [shape: bf16[2,32,64], index: 9, kind: input, shape index: {}]   ;;  %s3010_s10 = inlined_call_operand.vmem [shape: f32[2,1,64], index: 10, kind: input, shape index: {}]   ;;  %s3011_s11 = inlined_call_operand.vmem [shape: bf16[2,64,32], index: 11, kind: input, shape index: {}]   ;;  %s3012_s12 = inlined_call_operand.vmem [shape: f32[2,1,32], index: 12, kind: input, shape index: {}]   ;;  %s3013_s13 = inlined_call_operand.vmem [shape: f32[2,1,32], index: 13, kind: input, shape index: {}]   ;;  %s3014_s14 = inlined_call_operand.vmem [shape: f32[2,1,32], index: 14, kind: input, shape index: {}]   ;;  %s3015_s15 = inlined_call_operand.hbm [shape: f32[16,32], index: 15, kind: output, shape index: {}]  }
   0x1   :  { %3019 = sst [smem:[#allocation7_spill]] %s3001_s1 }
   0x2   :  { %3020 = sst [smem:[#allocation8_spill]] %s3002_s2 }
   0x3   :  { %3021 = sst [smem:[#allocation9_spill]] %s3003_s3 }
   0x4   :  { %3022 = sst [smem:[#allocation10_spill]] %s3005_s5 }
   0x5   :  { %3023 = sst [smem:[#allocation11_spill]] %s3015_s15 }
   0x6   :  { %20 = vsyncpa [#allocation3], 0  ;;  %s2655_s18 = smov 0  }
   0x7 LB: > { %3024 = sst [smem:[#allocation5_spill]] %s2555_s18  ;;  %s2661_s19 = sadd.s32 4294967295, %s2555_s18   ;;  %s2555_s18 = sphi %s2655_s18, %s26_s18  }
   0x8   : > { %p2178_p0 = scmp.ge.s32.totalorder %s2555_s18, 1  ;;  %p527_p1 = scmp.lt.s32.totalorder %s2555_s18, 3 }
   0xa   : > { %p528_p2 = pnand %p2178_p0, %p527_p1 }
   0xc   : > { %531 = sbr.rel (%p528_p2) target bundleno = 4484 (0x1184), region = 80 }
  0x13   : > { %p609_p3 = scmp.lt.s32.totalorder %s2661_s19, 1  ;;  %s3025_s3 = sld [smem:[#allocation9_spill]] }
  0x14   : > { %s3026_s5 = sld [smem:[#allocation10_spill]]  ;;  %p2187_p4 = scmp.ne.s32.totalorder %s2661_s19, 0 }
  0x15   : > { %s2667_s20 = scalar_select %p609_p3, %s2661_s19, 1 }
  0x16   : > { %657 = sbr.rel (%p2187_p4) target bundleno = 341 (0x155), region = 84  ;;  %v658_v0 = vld [vmem:[%s3000_s0] sm:$0xff] (!%p2187_p4)  ;;  %vm662_vm0 = vcmask (!%p2187_p4), 261120   ;;  %v659_v1 = vld [vmem:[%s3000_s0 + $0x8] sm:$0xff] (!%p2187_p4)  ;;  %s3028_s2 = sld [smem:[#allocation7_spill]] (!%p2187_p4) }
  0x17   : > { %s2232_s21 = sshll.u32 %s2667_s20, 4  ;;  %s646_s22 = scalar_lea.vmem %s3012_s12, %s2667_s20  ;;  %v663_v2 = vsel (!%p2187_p4), %vm662_vm0, %v658_v0, 0.0  ;;  %v666_v3 = vsel (!%p2187_p4), %vm662_vm0, %v659_v1, 0.0 }
  0x18   : > { %s649_s25 = scalar_lea.vmem %s3013_s13, %s2667_s20  ;;  %s652_s1 = scalar_lea.vmem %s3014_s14, %s2667_s20  ;;  %664 = vadd.xlane.f32.xlu0 (!%p2187_p4), %v663_v2 }
  0x19   : > { %s2677_s27 = scalar_lea.vmem %s3025_s3, %s2232_s21  ;;  %s2699_s3 = scalar_lea.vmem %s3009_s9, %s2232_s21 }
  0x1a   : > { %s2682_s30 = scalar_lea.vmem %s3026_s5, %s2232_s21  ;;  %s638_s5 = scalar_lea.vmem %s3010_s10, %s2667_s20 }
  0x1b   : > { %3027 = sst [smem:[#allocation6_spill]] %s2682_s30  ;;  %s2235_s30 = sshll.u32 %s2667_s20, 5 }
  0x1c   : > { %s2709_s18 = scalar_lea.vmem %s3011_s11, %s2235_s30  ;;  %667 = vadd.xlane.f32.xlu0 (!%p2187_p4), %v666_v3  ;;  %v2188_v21 = vld [vmem:[%s3028_s2] ss:$0 sm:$0xff] (!%p2187_p4)  ;;  %s3029_s21 = sld [smem:[#allocation8_spill]] (!%p2187_p4) }
  0x22   : > { %v2189_v23 = vld [vmem:[%s3029_s21] ss:$0 sm:$0xff] }
  0xa5   : > { %v665_v4 = vpop.xlane.xlu0 %664 }
  0xa6   : > { %v670_v5 = vmul.f32 0.03125, %v665_v4 }
  0xa8   : > { %v672_v6 = vsub.f32 %v658_v0, %v670_v5 }
  0xa9   : > { %v668_v7 = vpop.xlane.xlu0 %667 }
  0xaa   : > { %v671_v8 = vmul.f32 0.03125, %v668_v7  ;;  %v674_v9 = vmul.f32 %v672_v6, %v672_v6 }
  0xac   : > { %v673_v10 = vsub.f32 %v659_v1, %v671_v8  ;;  %v676_v11 = vsel %vm662_vm0, %v674_v9, 0.0 }
  0xad   : > { %677 = vadd.xlane.f32.xlu1 %v676_v11 }
  0xae   : > { %v675_v12 = vmul.f32 %v673_v10, %v673_v10 }
  0xb0   : > { %v679_v13 = vsel %vm662_vm0, %v675_v12, 0.0 }
  0xb1   : > { %680 = vadd.xlane.f32.xlu1 %v679_v13 }
 0x13a   : > { %v678_v14 = vpop.xlane.xlu1 %677 }
 0x13b   : > { %v682_v15 = vmul.f32 0.03125, %v678_v14 }
 0x13d   : > { %v684_v16 = vadd.f32 1e-12, %v682_v15 }
 0x13e   : > { %v681_v17 = vpop.xlane.xlu1 %680 }
 0x13f   : > { %2446 = vrsqrt.f32 %v684_v16  ;;  %v683_v18 = vmul.f32 0.03125, %v681_v17 }
 0x141   : > { %v685_v19 = vadd.f32 1e-12, %v683_v18 }
 0x143   : > { %2448 = vrsqrt.f32 %v685_v19 }
 0x149   : > { %v2447_v20 = vpop.eup %2446 }
 0x14a   : > { %v688_v22 = vmul.f32 %v2447_v20, %v672_v6 }
 0x14c   : > { %v696_v24 = vmul.f32 %v2188_v21, %v688_v22 }
 0x14d   : > { %v2449_v25 = vpop.eup %2448 }
 0x14e   : > { %v704_v26 = vadd.f32 %v2189_v23, %v696_v24  ;;  %v689_v27 = vmul.f32 %v2449_v25, %v673_v10 }
 0x150   : > { %706 = vst.msk [vmem:[#allocation2] sm:$0xff] %vm662_vm0, %v704_v26  ;;  %v697_v28 = vmul.f32 %v2188_v21, %v689_v27 }
 0x152   : > { %v705_v29 = vadd.f32 %v2189_v23, %v697_v28 }
 0x154   : > { %707 = vst.msk [vmem:[#allocation2 + $0x8] sm:$0xff] %vm662_vm0, %v705_v29 }
 0x155 PF: > { %v2465_v30 = vld [vmem:[%s2677_s27] sm:$0xff]   ;;  %v2557_v31 = vmov 0.0   ;;  %v2466_v32 = vld [vmem:[%s2677_s27 + $0x8] sm:$0xff]   ;;  %vm2558_vm1 = vmmov 0   ;;  %vm734_vm2 = vcmask 261120   ;;  %s3030_s28 = scalar_lea.vmem %s3004_s4, %s2667_s20  ;;  %s2559_s29 = smov 96  }
 0x156   : > { %2282 = vmatprep.subr.bf16.mxu0 %v2557_v31  ;;  %2290 = vmatprep.subr.bf16.mxu1 %v2557_v31  ;;  %v2190_v36 = vld [vmem:[%s3030_s28] ss:$0 sm:$0xff]  ;;  %vm784_vm3 = vcmask 64512   ;;  %s2560_s30 = smov 64   ;;  %s2561_s16 = smov 88   ;;  %vm909_vm4 = vcmask 1043456  }
 0x157   : > { %2283 = vmatpush3.bf16.msra.mxu0 %v2465_v30  ;;  %2286 = vmatprep.mubr.msk.bf16.mxu0 %vm2558_vm1, %v2557_v31  ;;  %v2748_v33 = vld [vmem:[#allocation2] sm:$0xff]  ;;  %s2562_s24 = smov 120   ;;  %s2563_s17 = smov 56   ;;  %vm1687_vm5 = vcmask 130048   ;;  %vm1690_vm6 = vcmask 195584   ;;  %vm1926_vm7 = vcmask 523264  }
 0x158   : > { %2284 = vmatprep.subr.bf16.mxu0 %v2557_v31  ;;  %2292 = vmatprep.mubr.msk.bf16.mxu1 %vm2558_vm1, %v2557_v31  ;;  %s2564_s2 = smov 80   ;;  %s2565_s15 = smov 112  }
 0x159   : > { %s2566_s23 = smov 48   ;;  %s2567_s21 = smov 72  }
 0x15a   : > { %s2568_s27 = smov 104   ;;  %s2569_s26 = smov 40  }
 0x15b   : > { %v2750_v34 = vld [vmem:[#allocation2 + $0x8] sm:$0xff]  ;;  %2285 = vmatpush3.bf16.msra.mxu0 %v2466_v32  ;;  %s2570_s28 = smov 8   ;;  %p2418_p5 = scmp.eq.s32.totalorder %s2661_s19, 1 }
 0x15c   : > { %v714_v35 = vpack.c.bf16 %v2750_v34, %v2748_v33  ;;  %2296 = vmatprep.subr.bf16.mxu0 %v2557_v31 }
 0x15e   : > { %2287 = vmatmul.mubr.msk.bf16.vlgmr.msra.gmra.mrb[0].mxu0 %vm734_vm2, %v714_v35 }
 0x15f   : > { %2298 = vmatprep.mubr.msk.bf16.mxu0 %vm2558_vm1, %v2557_v31 }
 0x231   : > { %v772_v37 = vpop.f32.mrb[0].mxu0 }
 0x232   : > { %v773_v38 = vadd.f32 %v2190_v36, %v772_v37  ;;  %v2288_v39 = vpop.f32.mrb[1].mxu0 }
 0x233   : > { %v775_v40 = vpop.f32.mrb[2].mxu0 }
 0x234   : > { %v2766_v41 = vpack.c.bf16 %v773_v38, %v773_v38  ;;  %v776_v42 = vadd.f32 %v2190_v36, %v775_v40  ;;  %v2289_v43 = vpop.f32.mrb[3].mxu0 }
 0x236   : > { %782 = vrot.lane.b32.xlu0 %v2766_v41, %s2559_s29  ;;  %v2769_v44 = vpack.c.bf16 %v776_v42, %v776_v42 }
 0x23a   : > { %832 = vrot.lane.b32.xlu0 %v2769_v44, %s2559_s29  ;;  %s2571_s29 = smov 16  }
 0x2a8   : > { %v783_v45 = vpop.permute.xlu0 %782 }
 0x2a9   : > { %v789_v46 = vsel %vm784_vm3, %v783_v45, 0 }
 0x2aa   : > { %2291 = vmatpush3.bf16.xpose.msra.mxu1 %v789_v46 }
 0x2ab   : > { %2302 = vmatprep.subr.bf16.mxu1 %v2557_v31 }
 0x2ac   : > { %v833_v47 = vpop.permute.xlu0 %832 }
 0x2ad   : > { %v838_v48 = vsel %vm784_vm3, %v833_v47, 0 }
 0x2ae   : > { %2297 = vmatpush3.bf16.xpose.msra.mxu0 %v838_v48 }
 0x2af   : > { %2308 = vmatprep.subr.bf16.mxu0 %v2557_v31 }
 0x2b1   : > { %2293 = vmatmul.mubr.msk.bf16.vlgmr.msra.gmra.mrb[0].mxu1 %vm784_vm3, %v2766_v41 }
 0x2b2   : > { %2304 = vmatprep.mubr.msk.bf16.mxu1 %vm2558_vm1, %v2557_v31 }
 0x2b5   : > { %2299 = vmatmul.mubr.msk.bf16.vlgmr.msra.gmra.mrb[4].mxu0 %vm784_vm3, %v2769_v44 }
 0x2b6   : > { %2310 = vmatprep.mubr.msk.bf16.mxu0 %vm2558_vm1, %v2557_v31 }
 0x384   : > { %v825_v49 = vpop.f32.mrb[0].mxu1 }
 0x385   : > { %v2294_v50 = vpop.f32.mrb[1].mxu1  ;;  %v880_v51 = vsel %vm784_vm3, %v825_v49, -inf }
 0x386   : > { %881 = vmax.xlane.f32.xlu1 %v880_v51  ;;  %v828_v52 = vpop.f32.mrb[2].mxu1 }
 0x387   : > { %v2295_v53 = vpop.f32.mrb[3].mxu1 }
 0x388   : > { %v874_v54 = vpop.f32.mrb[4].mxu0 }
 0x389   : > { %v2300_v55 = vpop.f32.mrb[5].mxu0  ;;  %v883_v56 = vsel %vm784_vm3, %v874_v54, -inf }
 0x38a   : > { %884 = vmax.xlane.f32.xlu1 %v883_v56  ;;  %v877_v57 = vpop.f32.mrb[6].mxu0 }
 0x38b   : > { %v2301_v58 = vpop.f32.mrb[7].mxu0 }
 0x39b   : > { %904 = vrot.lane.b32.xlu1 %v2766_v41, %s2560_s30 }
 0x39f   : > { %953 = vrot.lane.b32.xlu1 %v2769_v44, %s2560_s30  ;;  %s3031_s30 = sld [smem:[#allocation6_spill]] }
 0x3a3   : > { %1003 = vrot.lane.b32.xlu1 %v2766_v41, %s2561_s16 }
 0x413   : > { %v882_v59 = vpop.xlane.xlu1 %881 }
 0x414   : > { %v886_v60 = vsub.f32 %v825_v49, %v882_v59 }
 0x416   : > { %v888_v61 = vmul.f32 1.442695, %v886_v60 }
 0x417   : > { %v885_v62 = vpop.xlane.xlu1 %884 }
 0x418   : > { %2475 = vpow2.f32 %v888_v61  ;;  %v887_v63 = vsub.f32 %v874_v54, %v885_v62 }
 0x41a   : > { %v890_v0 = vmul.f32 1.442695, %v887_v63 }
 0x41b   : > { %v905_v1 = vpop.permute.xlu1 %904 }
 0x41c   : > { %2477 = vpow2.f32 %v890_v0  ;;  %v911_v2 = vsel %vm909_vm4, %v905_v1, 0 }
 0x41d   : > { %2303 = vmatpush3.bf16.msra.mxu1 %v911_v2 }
 0x41e   : > { %2314 = vmatprep.subr.bf16.mxu1 %v2557_v31 }
 0x41f   : > { %v954_v3 = vpop.permute.xlu1 %953 }
 0x420   : > { %v959_v4 = vsel %vm909_vm4, %v954_v3, 0 }
 0x421   : > { %2309 = vmatpush3.bf16.msra.mxu0 %v959_v4 }
 0x422   : > { %v2476_v5 = vpop.eup %2475  ;;  %2320 = vmatprep.subr.bf16.mxu0 %v2557_v31 }
 0x423   : > { %v892_v6 = vsel %vm784_vm3, %v2476_v5, 0.0  ;;  %v1004_v9 = vpop.permute.xlu1 %1003 }
 0x424   : > { %893 = vadd.xlane.f32.xlu0 %v892_v6  ;;  %v1009_v16 = vsel %vm784_vm3, %v1004_v9, 0 }
 0x426   : > { %v2478_v7 = vpop.eup %2477 }
 0x427   : > { %v895_v8 = vsel %vm784_vm3, %v2478_v7, 0.0 }
 0x428   : > { %896 = vadd.xlane.f32.xlu1 %v895_v8 }
 0x439   : > { %1053 = vrot.lane.b32.xlu1 %v2769_v44, %s2561_s16  ;;  %s2572_s16 = smov 24  }
 0x43a   : > { %1001 = vrot.lane.b32.xlu0 %v2766_v41, %s2562_s24 }
 0x43d   : > { %1051 = vrot.lane.b32.xlu1 %v2769_v44, %s2562_s24 }
 0x4b1   : > { %v894_v10 = vpop.xlane.xlu0 %893 }
 0x4b2   : > { %2479 = vrcp.f32 %v894_v10 }
 0x4b5   : > { %v897_v11 = vpop.xlane.xlu1 %896  ;;  %v1002_v21 = vpop.permute.xlu0 %1001 }
 0x4b6   : > { %2481 = vrcp.f32 %v897_v11 }
 0x4b9   : > { %v1054_v18 = vpop.permute.xlu1 %1053 }
 0x4ba   : > { %v1059_v20 = vsel %vm784_vm3, %v1054_v18, 0 }
 0x4bc   : > { %v2480_v12 = vpop.eup %2479 }
 0x4bd   : > { %v900_v13 = vmul.f32 %v2480_v12, %v2476_v5  ;;  %v1052_v22 = vpop.permute.xlu1 %1051 }
 0x4bf   : > { %v902_v14 = vpack.c.bf16 %v900_v13, %v900_v13 }
 0x4c0   : > { %v2482_v15 = vpop.eup %2481 }
 0x4c1   : > { %v901_v17 = vmul.f32 %v2482_v15, %v2478_v7  ;;  %2305 = vmatmul.mubr.msk.bf16.vlgmr.msra.gmra.mrb[4].mxu1 %vm784_vm3, %v902_v14 }
 0x4c2   : > { %2315 = vmatpush3.bf16.xpose.msra.mxu1 %v1009_v16  ;;  %2316 = vmatprep.mubr.msk.bf16.mxu1 %vm2558_vm1, %v2557_v31 }
 0x4c3   : > { %v903_v19 = vpack.c.bf16 %v901_v17, %v901_v17  ;;  %2326 = vmatprep.subr.bf16.mxu1 %v2557_v31 }
 0x4c5   : > { %2311 = vmatmul.mubr.msk.bf16.vlgmr.msra.gmra.mrb[8].mxu0 %vm784_vm3, %v903_v19 }
 0x4c6   : > { %2321 = vmatpush3.bf16.xpose.msra.mxu0 %v1059_v20  ;;  %2322 = vmatprep.mubr.msk.bf16.mxu0 %vm2558_vm1, %v2557_v31 }
 0x4c7   : > { %2332 = vmatprep.subr.bf16.mxu0 %v2557_v31 }
 0x4c9   : > { %2317 = vmatmul.mubr.msk.bf16.vlgmr.msra.gmra.mrb[8].mxu1 %vm784_vm3, %v1002_v21 }
 0x4ca   : > { %2328 = vmatprep.mubr.msk.bf16.mxu1 %vm2558_vm1, %v2557_v31 }
 0x4cd   : > { %2323 = vmatmul.mubr.msk.bf16.vlgmr.msra.gmra.mrb[12].mxu0 %vm784_vm3, %v1052_v22 }
 0x4ce   : > { %2334 = vmatprep.mubr.msk.bf16.mxu0 %vm2558_vm1, %v2557_v31 }
 0x594   : > { %v2814_v23 = vpop.f32.mrb[4].mxu1 }
 0x595   : > { %v2306_v24 = vpop.f32.mrb[5].mxu1 }
 0x596   : > { %v950_v25 = vpop.f32.mrb[6].mxu1 }
 0x597   : > { %v2307_v26 = vpop.f32.mrb[7].mxu1 }
 0x598   : > { %v2816_v27 = vpop.f32.mrb[8].mxu0 }
 0x599   : > { %v2312_v28 = vpop.f32.mrb[9].mxu0 }
 0x59a   : > { %v998_v29 = vpop.f32.mrb[10].mxu0 }
 0x59b   : > { %v2313_v30 = vpop.f32.mrb[11].mxu0 }
 0x59c   : > { %v1045_v32 = vpop.f32.mrb[8].mxu1 }
 0x59d   : > { %v2318_v35 = vpop.f32.mrb[9].mxu1  ;;  %v1101_v36 = vsel %vm784_vm3, %v1045_v32, -inf }
 0x59e   : > { %1102 = vmax.xlane.f32.xlu1 %v1101_v36  ;;  %v1048_v37 = vpop.f32.mrb[10].mxu1 }
 0x59f   : > { %v2319_v38 = vpop.f32.mrb[11].mxu1 }
 0x5a0   : > { %v1095_v39 = vpop.f32.mrb[12].mxu0 }
 0x5a1   : > { %v2324_v40 = vpop.f32.mrb[13].mxu0  ;;  %v1104_v42 = vsel %vm784_vm3, %v1095_v39, -inf }
 0x5a2   : > { %1105 = vmax.xlane.f32.xlu0 %v1104_v42  ;;  %v1098_v43 = vpop.f32.mrb[14].mxu0 }
 0x5a3   : > { %v2325_v45 = vpop.f32.mrb[15].mxu0 }
 0x5af   : > { %1125 = vrot.lane.b32.xlu1 %v2766_v41, %s2563_s17 }
 0x5b3   : > { %1223 = vrot.lane.b32.xlu1 %v2766_v41, %s2564_s2 }
 0x5b8   : > { %1173 = vrot.lane.b32.xlu0 %v2769_v44, %s2563_s17 }
 0x5bc   : > { %1221 = vrot.lane.b32.xlu0 %v2766_v41, %s2565_s15 }
 0x62b   : > { %v1103_v46 = vpop.xlane.xlu1 %1102 }
 0x62c   : > { %v1107_v47 = vsub.f32 %v1045_v32, %v1103_v46 }
 0x62e   : > { %v1109_v48 = vmul.f32 1.442695, %v1107_v47 }
 0x62f   : > { %v1126_v49 = vpop.permute.xlu1 %1125  ;;  %v1106_v50 = vpop.xlane.xlu0 %1105 }
 0x630   : > { %2483 = vpow2.f32 %v1109_v48  ;;  %v1131_v51 = vsel %vm909_vm4, %v1126_v49, 0  ;;  %v1108_v52 = vsub.f32 %v1095_v39, %v1106_v50 }
 0x631   : > { %2327 = vmatpush3.bf16.msra.mxu1 %v1131_v51 }
 0x632   : > { %v1111_v53 = vmul.f32 1.442695, %v1108_v52  ;;  %2338 = vmatprep.subr.bf16.mxu1 %v2557_v31 }
 0x633   : > { %v1174_v54 = vpop.permute.xlu0 %1173  ;;  %v1224_v60 = vpop.permute.xlu1 %1223 }
 0x634   : > { %2485 = vpow2.f32 %v1111_v53  ;;  %v1179_v55 = vsel %vm909_vm4, %v1174_v54, 0  ;;  %v1229_v3 = vsel %vm784_vm3, %v1224_v60, 0 }
 0x635   : > { %2333 = vmatpush3.bf16.msra.mxu0 %v1179_v55 }
 0x636   : > { %2344 = vmatprep.subr.bf16.mxu0 %v2557_v31 }
 0x637   : > { %v1222_v8 = vpop.permute.xlu0 %1221 }
 0x63a   : > { %v2484_v56 = vpop.eup %2483 }
 0x63b   : > { %v1113_v57 = vsel %vm784_vm3, %v2484_v56, 0.0 }
 0x63c   : > { %1114 = vadd.xlane.f32.xlu1 %v1113_v57 }
 0x63e   : > { %v2486_v58 = vpop.eup %2485 }
 0x63f   : > { %v1116_v59 = vsel %vm784_vm3, %v2486_v58, 0.0 }
 0x640   : > { %1117 = vadd.xlane.f32.xlu1 %v1116_v59 }
 0x651   : > { %1273 = vrot.lane.b32.xlu1 %v2769_v44, %s2564_s2  ;;  %s3032_s2 = scalar_lea.vmem %s3006_s6, %s2667_s20 }
 0x655   : > { %1271 = vrot.lane.b32.xlu1 %v2769_v44, %s2565_s15 }
 0x6c9   : > { %v1115_v61 = vpop.xlane.xlu1 %1114 }
 0x6ca   : > { %2487 = vrcp.f32 %v1115_v61 }
 0x6cd   : > { %v1118_v62 = vpop.xlane.xlu1 %1117 }
 0x6ce   : > { %2489 = vrcp.f32 %v1118_v62 }
 0x6d1   : > { %v1274_v5 = vpop.permute.xlu1 %1273 }
 0x6d2   : > { %v1279_v7 = vsel %vm784_vm3, %v1274_v5, 0 }
 0x6d4   : > { %v2488_v63 = vpop.eup %2487 }
 0x6d5   : > { %v1121_v0 = vmul.f32 %v2488_v63, %v2484_v56  ;;  %v1272_v9 = vpop.permute.xlu1 %1271 }
 0x6d7   : > { %v1123_v1 = vpack.c.bf16 %v1121_v0, %v1121_v0 }
 0x6d8   : > { %v2490_v2 = vpop.eup %2489 }
 0x6d9   : > { %v1122_v4 = vmul.f32 %v2490_v2, %v2486_v58  ;;  %2329 = vmatmul.mubr.msk.bf16.vlgmr.msra.gmra.mrb[12].mxu1 %vm784_vm3, %v1123_v1 }
 0x6da   : > { %2339 = vmatpush3.bf16.xpose.msra.mxu1 %v1229_v3  ;;  %2340 = vmatprep.mubr.msk.bf16.mxu1 %vm2558_vm1, %v2557_v31 }
 0x6db   : > { %v1124_v6 = vpack.c.bf16 %v1122_v4, %v1122_v4  ;;  %2350 = vmatprep.subr.bf16.mxu1 %v2557_v31 }
 0x6dd   : > { %2335 = vmatmul.mubr.msk.bf16.vlgmr.msra.gmra.mrb[16].mxu0 %vm784_vm3, %v1124_v6 }
 0x6de   : > { %2345 = vmatpush3.bf16.xpose.msra.mxu0 %v1279_v7  ;;  %2346 = vmatprep.mubr.msk.bf16.mxu0 %vm2558_vm1, %v2557_v31 }
 0x6df   : > { %2356 = vmatprep.subr.bf16.mxu0 %v2557_v31 }
 0x6e1   : > { %2341 = vmatmul.mubr.msk.bf16.vlgmr.msra.gmra.mrb[16].mxu1 %vm784_vm3, %v1222_v8 }
 0x6e2   : > { %2352 = vmatprep.mubr.msk.bf16.mxu1 %vm2558_vm1, %v2557_v31 }
 0x6e5   : > { %2347 = vmatmul.mubr.msk.bf16.vlgmr.msra.gmra.mrb[20].mxu0 %vm784_vm3, %v1272_v9 }
 0x6e6   : > { %2358 = vmatprep.mubr.msk.bf16.mxu0 %vm2558_vm1, %v2557_v31 }
 0x7ac   : > { %v2848_v10 = vpop.f32.mrb[12].mxu1 }
 0x7ad   : > { %v2330_v11 = vpop.f32.mrb[13].mxu1 }
 0x7ae   : > { %v1170_v12 = vpop.f32.mrb[14].mxu1 }
 0x7af   : > { %v2331_v13 = vpop.f32.mrb[15].mxu1 }
 0x7b0   : > { %v2850_v14 = vpop.f32.mrb[16].mxu0 }
 0x7b1   : > { %v2450_v15 = vpack.i.bf16 %v2850_v14, %v2848_v10  ;;  %v2336_v16 = vpop.f32.mrb[17].mxu0 }
 0x7b2   : > { %v1218_v17 = vpop.f32.mrb[18].mxu0 }
 0x7b3   : > { %v2337_v18 = vpop.f32.mrb[19].mxu0 }
 0x7b4   : > { %v1265_v19 = vpop.f32.mrb[16].mxu1 }
 0x7b5   : > { %v2342_v20 = vpop.f32.mrb[17].mxu1  ;;  %v1321_v21 = vsel %vm784_vm3, %v1265_v19, -inf }
 0x7b6   : > { %1322 = vmax.xlane.f32.xlu0 %v1321_v21  ;;  %v1268_v22 = vpop.f32.mrb[18].mxu1 }
 0x7b7   : > { %v2343_v24 = vpop.f32.mrb[19].mxu1 }
 0x7b8   : > { %v1315_v25 = vpop.f32.mrb[20].mxu0 }
 0x7b9   : > { %v2348_v26 = vpop.f32.mrb[21].mxu0  ;;  %v1324_v28 = vsel %vm784_vm3, %v1315_v25, -inf }
 0x7ba   : > { %1325 = vmax.xlane.f32.xlu1 %v1324_v28  ;;  %v1318_v29 = vpop.f32.mrb[22].mxu0 }
 0x7bb   : > { %v2349_v30 = vpop.f32.mrb[23].mxu0 }
 0x7cb   : > { %1345 = vrot.lane.b32.xlu1 %v2766_v41, %s2566_s23 }
 0x7cf   : > { %1443 = vrot.lane.b32.xlu1 %v2766_v41, %s2567_s21 }
 0x7d3   : > { %1493 = vrot.lane.b32.xlu1 %v2769_v44, %s2567_s21  ;;  %s3033_s21 = scalar_lea.vmem %s3007_s7, %s2667_s20 }
 0x7d7   : > { %1491 = vrot.lane.b32.xlu1 %v2769_v44, %s2568_s27 }
 0x843   : > { %v1323_v32 = vpop.xlane.xlu0 %1322 }
 0x844   : > { %v1327_v35 = vsub.f32 %v1265_v19, %v1323_v32 }
 0x846   : > { %v1329_v36 = vmul.f32 1.442695, %v1327_v35 }
 0x847   : > { %v1326_v37 = vpop.xlane.xlu1 %1325 }
 0x848   : > { %2491 = vpow2.f32 %v1329_v36  ;;  %v1328_v38 = vsub.f32 %v1315_v25, %v1326_v37 }
 0x84a   : > { %v1331_v39 = vmul.f32 1.442695, %v1328_v38 }
 0x84b   : > { %v1346_v40 = vpop.permute.xlu1 %1345 }
 0x84c   : > { %2493 = vpow2.f32 %v1331_v39  ;;  %v1351_v42 = vsel %vm909_vm4, %v1346_v40, 0 }
 0x84d   : > { %2351 = vmatpush3.bf16.msra.mxu1 %v1351_v42 }
 0x84e   : > { %2362 = vmatprep.subr.bf16.mxu1 %v2557_v31 }
 0x84f   : > { %v1444_v53 = vpop.permute.xlu1 %1443 }
 0x850   : > { %v1449_v57 = vsel %vm784_vm3, %v1444_v53, 0 }
 0x852   : > { %v2492_v43 = vpop.eup %2491 }
 0x853   : > { %v1333_v45 = vsel %vm784_vm3, %v2492_v43, 0.0  ;;  %v1494_v59 = vpop.permute.xlu1 %1493 }
 0x854   : > { %1334 = vadd.xlane.f32.xlu0 %v1333_v45  ;;  %v1499_v61 = vsel %vm784_vm3, %v1494_v59, 0 }
 0x856   : > { %v2494_v46 = vpop.eup %2493 }
 0x857   : > { %v1336_v47 = vsel %vm784_vm3, %v2494_v46, 0.0  ;;  %v1492_v63 = vpop.permute.xlu1 %1491 }
 0x858   : > { %1337 = vadd.xlane.f32.xlu0 %v1336_v47  ;;  %v2468_v47 = vld [vmem:[%s3031_s30 + $0x8] sm:$0xff]  }
 0x86e   : > { %1393 = vrot.lane.b32.xlu0 %v2769_v44, %s2566_s23 }
 0x872   : > { %1441 = vrot.lane.b32.xlu0 %v2766_v41, %s2568_s27 }
 0x8e1   : > { %v1335_v48 = vpop.xlane.xlu0 %1334 }
 0x8e2   : > { %2495 = vrcp.f32 %v1335_v48 }
 0x8e5   : > { %v1338_v49 = vpop.xlane.xlu0 %1337 }
 0x8e6   : > { %2497 = vrcp.f32 %v1338_v49 }
 0x8e9   : > { %v1394_v50 = vpop.permute.xlu0 %1393 }
 0x8ea   : > { %v1399_v51 = vsel %vm909_vm4, %v1394_v50, 0 }
 0x8eb   : > { %2357 = vmatpush3.bf16.msra.mxu0 %v1399_v51 }
 0x8ec   : > { %v2496_v52 = vpop.eup %2495  ;;  %2368 = vmatprep.subr.bf16.mxu0 %v2557_v31 }
 0x8ed   : > { %v1341_v54 = vmul.f32 %v2496_v52, %v2492_v43  ;;  %v1442_v62 = vpop.permute.xlu0 %1441 }
 0x8ef   : > { %v1343_v55 = vpack.c.bf16 %v1341_v54, %v1341_v54 }
 0x8f0   : > { %v2498_v56 = vpop.eup %2497 }
 0x8f1   : > { %v1342_v58 = vmul.f32 %v2498_v56, %v2494_v46  ;;  %2353 = vmatmul.mubr.msk.bf16.vlgmr.msra.gmra.mrb[20].mxu1 %vm784_vm3, %v1343_v55  ;;  %v2467_v46 = vld [vmem:[%s3031_s30] sm:$0xff]  }
 0x8f2   : > { %2363 = vmatpush3.bf16.xpose.msra.mxu1 %v1449_v57  ;;  %2364 = vmatprep.mubr.msk.bf16.mxu1 %vm2558_vm1, %v2557_v31 }
 0x8f3   : > { %v1344_v60 = vpack.c.bf16 %v1342_v58, %v1342_v58  ;;  %2374 = vmatprep.subr.bf16.mxu1 %v2557_v31 }
 0x8f5   : > { %2359 = vmatmul.mubr.msk.bf16.vlgmr.msra.gmra.mrb[24].mxu0 %vm784_vm3, %v1344_v60 }
 0x8f6   : > { %2369 = vmatpush3.bf16.xpose.msra.mxu0 %v1499_v61  ;;  %2370 = vmatprep.mubr.msk.bf16.mxu0 %vm2558_vm1, %v2557_v31 }
 0x8f7   : > { %2380 = vmatprep.subr.bf16.mxu0 %v2557_v31 }
 0x8f9   : > { %2365 = vmatmul.mubr.msk.bf16.vlgmr.msra.gmra.mrb[24].mxu1 %vm784_vm3, %v1442_v62 }
 0x8fa   : > { %2376 = vmatprep.mubr.msk.bf16.mxu1 %vm2558_vm1, %v2557_v31 }
 0x8fd   : > { %2371 = vmatmul.mubr.msk.bf16.vlgmr.msra.gmra.mrb[28].mxu0 %vm784_vm3, %v1492_v63 }
 0x8fe   : > { %2382 = vmatprep.mubr.msk.bf16.mxu0 %vm2558_vm1, %v2557_v31 }
 0x9c4   : > { %v1387_v0 = vpop.f32.mrb[20].mxu1 }
 0x9c5   : > { %v2354_v1 = vpop.f32.mrb[21].mxu1 }
 0x9c6   : > { %v1390_v2 = vpop.f32.mrb[22].mxu1 }
 0x9c7   : > { %v2355_v3 = vpop.f32.mrb[23].mxu1 }
 0x9c8   : > { %v1435_v4 = vpop.f32.mrb[24].mxu0 }
 0x9c9   : > { %v2455_v5 = vpack.i.bf16 %v1435_v4, %v1387_v0  ;;  %v2360_v6 = vpop.f32.mrb[25].mxu0 }
 0x9ca   : > { %v1438_v7 = vpop.f32.mrb[26].mxu0 }
 0x9cb   : > { %v2361_v8 = vpop.f32.mrb[27].mxu0 }
 0x9cc   : > { %v1485_v9 = vpop.f32.mrb[24].mxu1 }
 0x9cd   : > { %v2366_v11 = vpop.f32.mrb[25].mxu1  ;;  %v1541_v12 = vsel %vm784_vm3, %v1485_v9, -inf }
 0x9ce   : > { %1542 = vmax.xlane.f32.xlu0 %v1541_v12  ;;  %v1488_v13 = vpop.f32.mrb[26].mxu1 }
 0x9cf   : > { %v2367_v16 = vpop.f32.mrb[27].mxu1 }
 0x9d0   : > { %v1535_v17 = vpop.f32.mrb[28].mxu0 }
 0x9d1   : > { %v2372_v18 = vpop.f32.mrb[29].mxu0  ;;  %v1544_v19 = vsel %vm784_vm3, %v1535_v17, -inf }
 0x9d2   : > { %1545 = vmax.xlane.f32.xlu1 %v1544_v19  ;;  %v1538_v20 = vpop.f32.mrb[30].mxu0 }
 0x9d3   : > { %v2373_v21 = vpop.f32.mrb[31].mxu0 }
 0x9e3   : > { %1565 = vrot.lane.b32.xlu1 %v2766_v41, %s2569_s26 }
 0x9e7   : > { %2451 = vrot.lane.b32.xlu1 %v2450_v15, %s2570_s28 }
 0x9eb   : > { %2456 = vrot.lane.b32.xlu1 %v2455_v5, %s2571_s29 }
 0xa5b   : > { %v1543_v22 = vpop.xlane.xlu0 %1542 }
 0xa5c   : > { %v1547_v24 = vsub.f32 %v1485_v9, %v1543_v22 }
 0xa5e   : > { %v1549_v25 = vmul.f32 1.442695, %v1547_v24 }
 0xa5f   : > { %v1546_v26 = vpop.xlane.xlu1 %1545 }
 0xa60   : > { %2499 = vpow2.f32 %v1549_v25  ;;  %v1548_v28 = vsub.f32 %v1535_v17, %v1546_v26 }
 0xa62   : > { %v1551_v29 = vmul.f32 1.442695, %v1548_v28 }
 0xa63   : > { %v1566_v30 = vpop.permute.xlu1 %1565 }
 0xa64   : > { %2501 = vpow2.f32 %v1551_v29  ;;  %v1571_v32 = vsel %vm909_vm4, %v1566_v30, 0 }
 0xa65   : > { %2375 = vmatpush3.bf16.msra.mxu1 %v1571_v32 }
 0xa66   : > { %2386 = vmatprep.subr.bf16.mxu1 %v2557_v31 }
 0xa67   : > { %v2452_v57 = vpop.permute.xlu1 %2451 }
 0xa68   : > { %v2454_v59 = vunpack.i.h.bf16 %v2452_v57  ;;  %v2453_v60 = vunpack.i.l.bf16 %v2452_v57 }
 0xa6a   : > { %v2500_v41 = vpop.eup %2499  ;;  %v1686_v0 = vsel %vm784_vm3, %v2816_v27, %v2454_v59  ;;  %v1685_v1 = vsel %vm784_vm3, %v2814_v23, %v2453_v60  ;;  %v2210_v27 = vld [vmem:[%s3032_s2] ss:$0 sm:$0xff]  ;;  %s2573_s2 = smov [#allocation2]  }
 0xa6b   : > { %v1553_v10 = vsel %vm784_vm3, %v2500_v41, 0.0  ;;  %v2457_v58 = vpop.permute.xlu1 %2456  ;;  %s2025_s15 = sshll.u32 %s2573_s2, 4  ;;  %s2026_s15 = int_to_ptr.vmem [resolvable:$true] %s2025_s15 }
 0xa6c   : > { %1554 = vadd.xlane.f32.xlu0 %v1553_v10  ;;  %v2459_v61 = vunpack.i.h.bf16 %v2457_v58  ;;  %v2458_v62 = vunpack.i.l.bf16 %v2457_v58  ;;  %p2526_p9 = scmp.lt.s32.totalorder %s2026_s15, %s2026_s15 }
 0xa6e   : > { %v2502_v14 = vpop.eup %2501  ;;  %v1688_v4 = vsel %vm1687_vm5, %v1685_v1, %v2458_v62  ;;  %v1689_v5 = vsel %vm1687_vm5, %v1686_v0, %v2459_v61 }
 0xa6f   : > { %v1556_v15 = vsel %vm784_vm3, %v2502_v14, 0.0 }
 0xa70   : > { %1557 = vadd.xlane.f32.xlu0 %v1556_v15 }
 0xa86   : > { %1613 = vrot.lane.b32.xlu0 %v2769_v44, %s2569_s26  ;;  %s3034_s26 = scalar_lea.vmem %s3008_s8, %s2667_s20 }
 0xaf9   : > { %v1555_v35 = vpop.xlane.xlu0 %1554 }
 0xafa   : > { %2503 = vrcp.f32 %v1555_v35 }
 0xafd   : > { %v1558_v36 = vpop.xlane.xlu0 %1557 }
 0xafe   : > { %2505 = vrcp.f32 %v1558_v36 }
 0xb01   : > { %v1614_v37 = vpop.permute.xlu0 %1613 }
 0xb02   : > { %v1619_v38 = vsel %vm909_vm4, %v1614_v37, 0 }
 0xb03   : > { %2381 = vmatpush3.bf16.msra.mxu0 %v1619_v38 }
 0xb04   : > { %v2504_v39 = vpop.eup %2503  ;;  %2394 = vmatprep.subr.bf16.mxu0 %v2557_v31 }
 0xb05   : > { %v1561_v40 = vmul.f32 %v2504_v39, %v2500_v41  ;;  %v2470_v41 = vld [vmem:[%s2699_s3 + $0x8] sm:$0xff]   ;;  %v2214_v39 = vld [vmem:[%s3033_s21] ss:$0 sm:$0xff] }
 0xb07   : > { %v1563_v42 = vpack.c.bf16 %v1561_v40, %v1561_v40 }
 0xb08   : > { %v2506_v43 = vpop.eup %2505 }
 0xb09   : > { %v1562_v45 = vmul.f32 %v2506_v43, %v2502_v14  ;;  %2377 = vmatmul.mubr.msk.bf16.vlgmr.msra.gmra.mrb[28].mxu1 %vm784_vm3, %v1563_v42 }
 0xb0a   : > { %2390 = vmatprep.mubr.msk.bf16.mxu1 %vm2558_vm1, %v2557_v31  ;;  %2387 = vmatpush3.bf16.msra.mxu1 %v2467_v46 }
 0xb0b   : > { %v1564_v44 = vpack.c.bf16 %v1562_v45, %v1562_v45  ;;  %2388 = vmatprep.subr.bf16.mxu1 %v2557_v31 }
 0xb0d   : > { %2383 = vmatmul.mubr.msk.bf16.vlgmr.msra.gmra.mrb[32].mxu0 %vm784_vm3, %v1564_v44  ;;  %v2215_v44 = vld [vmem:[%s3034_s26] ss:$0 sm:$0xff] }
 0xb0e   : > { %2398 = vmatprep.mubr.msk.bf16.mxu0 %vm2558_vm1, %v2557_v31  ;;  %2389 = vmatpush3.bf16.msra.mxu1 %v2468_v47 }
 0xb0f   : > { %2402 = vmatprep.subr.bf16.mxu1 %v2557_v31 }
 0xbdc   : > { %v1607_v48 = vpop.f32.mrb[28].mxu1 }
 0xbdd   : > { %v2378_v49 = vpop.f32.mrb[29].mxu1 }
 0xbde   : > { %v1610_v50 = vpop.f32.mrb[30].mxu1 }
 0xbdf   : > { %v2379_v51 = vpop.f32.mrb[31].mxu1  ;;  %v2471_v50 = vld [vmem:[%s2709_s18] sm:$0xff]  }
 0xbe0   : > { %v1655_v52 = vpop.f32.mrb[32].mxu0  ;;  %v2472_v51 = vld [vmem:[%s2709_s18 + $0x8] sm:$0xff]  }
 0xbe1   : > { %v2460_v53 = vpack.i.bf16 %v1655_v52, %v1607_v48  ;;  %v2384_v54 = vpop.f32.mrb[33].mxu0  ;;  %v2473_v52 = vld [vmem:[%s2709_s18 + $0x10] sm:$0xff]  }
 0xbe2   : > { %v1658_v55 = vpop.f32.mrb[34].mxu0  ;;  %v2216_v54 = vld [vmem:[%s638_s5] ss:$0 sm:$0xff] }
 0xbe3   : > { %2461 = vrot.lane.b32.xlu0 %v2460_v53, %s2572_s16  ;;  %v2385_v56 = vpop.f32.mrb[35].mxu0  ;;  %v2474_v53 = vld [vmem:[%s2709_s18 + $0x18] sm:$0xff]  }
 0xc55   : > { %v2462_v63 = vpop.permute.xlu0 %2461 }
 0xc56   : > { %v2464_v2 = vunpack.i.h.bf16 %v2462_v63  ;;  %v2463_v3 = vunpack.i.l.bf16 %v2462_v63 }
 0xc58   : > { %v1692_v6 = vsel %vm1690_vm6, %v1689_v5, %v2464_v2  ;;  %v1691_v7 = vsel %vm1690_vm6, %v1688_v4, %v2463_v3 }
 0xc59   : > { %v1697_v8 = vpack.c.bf16 %v1692_v6, %v1691_v7  ;;  %v2220_v7 = vld [vmem:[%s646_s22] ss:$0 sm:$0xff] }
 0xc5b   : > { %2391 = vmatmul.mubr.msk.bf16.vlgmr.msra.gmra.mrb[32].mxu1 %vm734_vm2, %v1697_v8 }
 0xc5c   : > { %2410 = vmatprep.mubr.msk.bf16.mxu1 %vm2558_vm1, %v2557_v31  ;;  %2403 = vmatpush3.bf16.msra.mxu1 %v2471_v50 }
 0xc5d   : > { %2404 = vmatprep.subr.bf16.mxu1 %v2557_v31 }
 0xc60   : > { %2405 = vmatpush3.bf16.msra.mxu1 %v2472_v51 }
 0xc61   : > { %2406 = vmatprep.subr.bf16.mxu1 %v2557_v31 }
 0xc64   : > { %2407 = vmatpush3.bf16.msra.mxu1 %v2473_v52 }
 0xc65   : > { %2408 = vmatprep.subr.bf16.mxu1 %v2557_v31 }
 0xc68   : > { %2409 = vmatpush3.bf16.msra.mxu1 %v2474_v53 }
 0xd2e   : > { %v1754_v9 = vpop.f32.mrb[32].mxu1 }
 0xd2f   : > { %v1755_v11 = vadd.f32 %v2210_v27, %v1754_v9  ;;  %v2392_v23 = vpop.f32.mrb[33].mxu1 }
 0xd30   : > { %v1757_v12 = vpop.f32.mrb[34].mxu1 }
 0xd31   : > { %v1758_v13 = vadd.f32 %v2210_v27, %v1757_v12  ;;  %v2393_v16 = vpop.f32.mrb[35].mxu1  ;;  %v1761_v17 = vadd.f32 %v1755_v11, %v2748_v33 }
 0xd33   : > { %v1765_v18 = vsel %vm734_vm2, %v1761_v17, 0.0  ;;  %v1762_v19 = vadd.f32 %v1758_v13, %v2750_v34  ;;  %v2469_v34 = vld [vmem:[%s2699_s3] sm:$0xff]  }
 0xd34   : > { %1766 = vadd.xlane.f32.xlu1 %v1765_v18  ;;  %2395 = vmatpush3.bf16.msra.mxu0 %v2469_v34 }
 0xd35   : > { %v1768_v20 = vsel %vm734_vm2, %v1762_v19, 0.0  ;;  %2396 = vmatprep.subr.bf16.mxu0 %v2557_v31 }
 0xd36   : > { %1769 = vadd.xlane.f32.xlu0 %v1768_v20 }
 0xd38   : > { %2397 = vmatpush3.bf16.msra.mxu0 %v2470_v41 }
 0xdc1   : > { %v1767_v21 = vpop.xlane.xlu1 %1766 }
 0xdc2   : > { %v1772_v22 = vmul.f32 0.03125, %v1767_v21 }
 0xdc3   : > { %v1770_v24 = vpop.xlane.xlu0 %1769 }
 0xdc4   : > { %v1774_v25 = vsub.f32 %v1761_v17, %v1772_v22  ;;  %v1773_v26 = vmul.f32 0.03125, %v1770_v24 }
 0xdc6   : > { %v1775_v28 = vsub.f32 %v1762_v19, %v1773_v26  ;;  %v1776_v29 = vmul.f32 %v1774_v25, %v1774_v25 }
 0xdc8   : > { %v1778_v30 = vsel %vm734_vm2, %v1776_v29, 0.0  ;;  %v1777_v33 = vmul.f32 %v1775_v28, %v1775_v28 }
 0xdc9   : > { %1779 = vadd.xlane.f32.xlu0 %v1778_v30 }
 0xdca   : > { %v1781_v32 = vsel %vm734_vm2, %v1777_v33, 0.0 }
 0xdcb   : > { %1782 = vadd.xlane.f32.xlu1 %v1781_v32 }
 0xe56   : > { %v1780_v10 = vpop.xlane.xlu0 %1779 }
 0xe57   : > { %v1784_v14 = vmul.f32 0.03125, %v1780_v10 }
 0xe58   : > { %v1783_v15 = vpop.xlane.xlu1 %1782 }
 0xe59   : > { %v1786_v35 = vadd.f32 1e-12, %v1784_v14  ;;  %v1785_v36 = vmul.f32 0.03125, %v1783_v15 }
 0xe5b   : > { %2507 = vrsqrt.f32 %v1786_v35  ;;  %v1787_v37 = vadd.f32 1e-12, %v1785_v36  ;;  %v2226_v35 = vld [vmem:[%s649_s25] ss:$0 sm:$0xff]  ;;  %s2519_s25 = scalar_lea.vmem %s2026_s15, 256 }
 0xe5c   : > { %p2520_p6 = scmp.ne.s32.totalorder %s2026_s15, %s2519_s25  ;;  %p2527_p10 = scmp.lt.s32.totalorder %s2519_s25, %s2519_s25 }
 0xe5d   : > { %2509 = vrsqrt.f32 %v1787_v37 }
 0xe5e   : > { %p2521_p7 = pnand %p2520_p6, %p2418_p5  ;;  %p2528_p11 = por %p2527_p10, %p2526_p9 }
 0xe60   : > { %p2522_p8 = pneg %p2521_p7 }
 0xe62   : > { %p2529_p12 = pnand %p2528_p11, %p2522_p8 }
 0xe65   : > { %v2508_v38 = vpop.eup %2507 }
 0xe66   : > { %v1790_v40 = vmul.f32 %v2508_v38, %v1774_v25  ;;  %v2227_v38 = vld [vmem:[%s652_s1] ss:$0 sm:$0xff] }
 0xe67   : > { %v2510_v42 = vpop.eup %2509 }
 0xe68   : > { %v1798_v43 = vmul.f32 %v2214_v39, %v1790_v40  ;;  %v1791_v45 = vmul.f32 %v2510_v42, %v1775_v28 }
 0xe6a   : > { %v1799_v46 = vmul.f32 %v2214_v39, %v1791_v45  ;;  %v1806_v47 = vadd.f32 %v2215_v44, %v1798_v43 }
 0xe6c   : > { %v1807_v48 = vadd.f32 %v2215_v44, %v1799_v46 }
 0xe6e   : > { %v1812_v49 = vpack.c.bf16 %v1807_v48, %v1806_v47 }
 0xe70   : > { %2399 = vmatmul.mubr.msk.bf16.vlgmr.msra.gmra.mrb[36].mxu0 %vm734_vm2, %v1812_v49 }
 0xf43   : > { %v1869_v55 = vpop.f32.mrb[36].mxu0 }
 0xf44   : > { %v1870_v56 = vadd.f32 %v2216_v54, %v1869_v55  ;;  %v2400_v57 = vpop.f32.mrb[37].mxu0 }
 0xf45   : > { %v1872_v58 = vpop.f32.mrb[38].mxu0 }
 0xf46   : > { %v1878_v59 = vmul.f32 0.70710677, %v1870_v56  ;;  %v1873_v60 = vadd.f32 %v2216_v54, %v1872_v58  ;;  %v2401_v61 = vpop.f32.mrb[39].mxu0  ;;  %v1876_v1 = vmul.f32 0.5, %v1870_v56 }
 0xf48   : > { %2511 = verf.f32 %v1878_v59  ;;  %v1879_v62 = vmul.f32 0.70710677, %v1873_v60  ;;  %v1877_v2 = vmul.f32 0.5, %v1873_v60 }
 0xf4a   : > { %2513 = verf.f32 %v1879_v62 }
 0xf52   : > { %v2512_v63 = vpop.eup %2511 }
 0xf53   : > { %v1882_v31 = vadd.f32 1.0, %v2512_v63 }
 0xf54   : > { %v2514_v0 = vpop.eup %2513 }
 0xf55   : > { %v1883_v3 = vadd.f32 1.0, %v2514_v0  ;;  %v1884_v4 = vmul.f32 %v1882_v31, %v1876_v1 }
 0xf57   : > { %v1885_v5 = vmul.f32 %v1883_v3, %v1877_v2 }
 0xf59   : > { %v1894_v6 = vpack.c.bf16 %v1885_v5, %v1884_v4 }
 0xf5b   : > { %2411 = vmatmul.mubr.msk.bf16.vlgmr.msra.gmra.mrb[36].mxu1 %vm1926_vm7, %v1894_v6 }
0x102e   : > { %v1964_v8 = vpop.f32.mrb[36].mxu1 }
0x102f   : > { %v1965_v27 = vadd.f32 %v2220_v7, %v1964_v8  ;;  %v2412_v9 = vpop.f32.mrb[37].mxu1 }
0x1030   : > { %v1967_v11 = vpop.f32.mrb[38].mxu1 }
0x1031   : > { %v1968_v23 = vadd.f32 %v2220_v7, %v1967_v11  ;;  %v2413_v12 = vpop.f32.mrb[39].mxu1  ;;  %v1971_v13 = vadd.f32 %v1965_v27, %v1806_v47 }
0x1033   : > { %v1975_v16 = vsel %vm734_vm2, %v1971_v13, 0.0  ;;  %v1972_v17 = vadd.f32 %v1968_v23, %v1807_v48 }
0x1034   : > { %1976 = vadd.xlane.f32.xlu0 %v1975_v16 }
0x1035   : > { %v1978_v18 = vsel %vm734_vm2, %v1972_v17, 0.0 }
0x1036   : > { %1979 = vadd.xlane.f32.xlu1 %v1978_v18 }
0x10c1   : > { %v1977_v19 = vpop.xlane.xlu0 %1976 }
0x10c2   : > { %v1981_v20 = vmul.f32 0.03125, %v1977_v19 }
0x10c3   : > { %v1980_v21 = vpop.xlane.xlu1 %1979 }
0x10c4   : > { %v1983_v22 = vsub.f32 %v1971_v13, %v1981_v20  ;;  %v1982_v24 = vmul.f32 0.03125, %v1980_v21 }
0x10c6   : > { %v1984_v25 = vsub.f32 %v1972_v17, %v1982_v24  ;;  %v1985_v26 = vmul.f32 %v1983_v22, %v1983_v22 }
0x10c8   : > { %v1987_v28 = vsel %vm734_vm2, %v1985_v26, 0.0  ;;  %v1986_v29 = vmul.f32 %v1984_v25, %v1984_v25 }
0x10c9   : > { %1988 = vadd.xlane.f32.xlu0 %v1987_v28 }
0x10ca   : > { %v1990_v30 = vsel %vm734_vm2, %v1986_v29, 0.0 }
0x10cb   : > { %1991 = vadd.xlane.f32.xlu1 %v1990_v30 }
0x1156   : > { %v1989_v33 = vpop.xlane.xlu0 %1988 }
0x1157   : > { %v1993_v32 = vmul.f32 0.03125, %v1989_v33 }
0x1158   : > { %v1992_v34 = vpop.xlane.xlu1 %1991 }
0x1159   : > { %v1995_v41 = vadd.f32 1e-12, %v1993_v32  ;;  %v1994_v10 = vmul.f32 0.03125, %v1992_v34 }
0x115b   : > { %2515 = vrsqrt.f32 %v1995_v41  ;;  %v1996_v14 = vadd.f32 1e-12, %v1994_v10 }
0x115d   : > { %2517 = vrsqrt.f32 %v1996_v14 }
0x1165   : > { %v2516_v15 = vpop.eup %2515 }
0x1166   : > { %v1999_v36 = vmul.f32 %v2516_v15, %v1983_v22 }
0x1167   : > { %v2518_v37 = vpop.eup %2517 }
0x1168   : > { %v2007_v39 = vmul.f32 %v2226_v35, %v1999_v36  ;;  %v2000_v40 = vmul.f32 %v2518_v37, %v1984_v25 }
0x116a   : > { %v2008_v42 = vmul.f32 %v2226_v35, %v2000_v40  ;;  %v2015_v43 = vadd.f32 %v2227_v38, %v2007_v39 }
0x116c   : > { %v2016_v45 = vadd.f32 %v2227_v38, %v2008_v42  ;;  %2017 = vst.msk [vmem:[#allocation2] sm:$0xff] %vm734_vm2, %v2015_v43 }
0x116e   : > { %2018 = vst.msk [vmem:[#allocation2 + $0x8] sm:$0xff] %vm734_vm2, %v2016_v45 }
0x116f   : > { %2532 = shalt.err (!%p2529_p12)
}
0x1170   : > { %s3035_s23 = sld [smem:[#allocation11_spill]] }
0x1176   : > { %s2533_s21 = scalar_lea.hbm %s3035_s23, 256 }
0x1177   : > { %p2534_p13 = scmp.ne.s32.totalorder %s3035_s23, %s2533_s21  ;;  %p2539_p2 = scmp.lt.u32.totalorder %s2533_s21, %s3035_s23 }
0x1179   : > { %p2535_p0 = pnand %p2534_p13, %p2418_p5 }
0x117b   : > { %p2536_p1 = pneg %p2535_p0 }
0x117d   : > { %p2541_p3 = pnand %p2539_p2, %p2536_p1 }
0x117f   : > { %2544 = shalt.err (!%p2541_p3)
}
0x1180   : > { %s2574_s30 = smov 128  }
0x1181   : > { %2415 = dma.vmem_to_hbm [thread:$0]  (%p2418_p5), %s2026_s15, 256, %s3035_s23, [#allocation3], %s2574_s30, %s2574_s30, %s2570_s28  }
0x1182   : > { %2550 = dma.done.wait (%p2418_p5), [#allocation3], 256  }
0x1183   : > { %2552 = vsyncadd (%p2418_p5), [#allocation3], 4294967040 }
0x1184 PF: > { %s3036_s22 = sld [smem:[#allocation5_spill]] }
0x118a   : > { %s26_s18 = sadd.s32 1, %s3036_s22  }
0x118b   : > { %p23_p4 = scmp.ge.s32.totalorder %s26_s18, 4  }
0x118d   :  { %25 = sbr.rel (!%p23_p4) target bundleno = 7 (0x7), region = 144 }
0x1194   :  { %2041 = vsyncpa [#allocation3], 1 }
0x1195   :  { %2043 = vsyncpa [#allocation3 + $0x1], 1 }

</bundles_post_ra>
